<compile_context>
chip_gen: v6e
topology: v6e:2x2x1
jax: 0.10.0
libtpu: 0.0.40
codegen_flags: <defaults>
</compile_context>

<pallas_src>
import functools

import jax
import jax.numpy as jnp
from jax.experimental import pallas as pl
from jax.experimental.pallas import tpu as pltpu

K_HOPS = 3  # SGConv K


def _round_up(x, m):
    return ((x + m - 1) // m) * m


def _subgcn_kernel(s_ref, h0_ref, b_ref, p_ref, o_ref, h_buf, acc_ref,
                   *, tile, n_col, n_hops, s_resident):
    """Grid = (K_HOPS, row_tiles, col_tiles); col axis is the S@h reduction.

    s_ref:   resident (N_pad, N_pad) bf16  OR streamed (tile, tile) bf16
    h0_ref:  (tile, H_pad) bf16   -- streamed column tile of h0 = X @ W
    b_ref:   (1, H_pad) f32       -- bias
    p_ref:   (G, tile) bf16       -- column slice of the mean-pool matrix
    o_ref:   (G, H_pad) f32       -- resident pooled-output accumulator
    h_buf:   (2, N_pad, H_pad) bf16 -- ping-pong node features across hops
    acc_ref: (tile, H_pad) f32    -- per-row-tile accumulator over the col axis
    """
    k = pl.program_id(0)
    i = pl.program_id(1)
    j = pl.program_id(2)

    row0 = pl.multiple_of(i * tile, tile)
    col0 = pl.multiple_of(j * tile, tile)

    # One-time init of the resident pooled-output block.
    @pl.when((k == 0) & (i == 0) & (j == 0))
    def _():
        o_ref[...] = jnp.zeros_like(o_ref)

    # Hop-0 source: stream h0 tiles into ping-pong slot 1 exactly once (during
    # the first row pass of hop 0); every hop then reads h_buf uniformly.
    @pl.when((k == 0) & (i == 0))
    def _():
        h_buf[1, pl.ds(col0, tile), :] = h0_ref[...]

    # Dynamic ping-pong: hop k reads slot (k+1)%2 and writes slot k%2.
    src_slot = (k + 1) % 2
    dst_slot = k % 2

    if s_resident:
        s_tile = s_ref[pl.ds(row0, tile), pl.ds(col0, tile)]
    else:
        s_tile = s_ref[...]

    h_src = h_buf[src_slot, pl.ds(col0, tile), :]
    prod = jnp.dot(s_tile, h_src, preferred_element_type=jnp.float32)

    # Store-first on j == 0 (no zero-fill + RMW), accumulate afterwards.
    @pl.when(j == 0)
    def _():
        acc_ref[...] = prod

    @pl.when(j > 0)
    def _():
        acc_ref[...] += prod

    # Row tile finished for this hop.
    @pl.when(j == n_col - 1)
    def _():
        @pl.when(k < n_hops - 1)
        def _():
            h_buf[dst_slot, pl.ds(row0, tile), :] = acc_ref[...].astype(h_buf.dtype)

        # Last hop: fuse bias + ReLU + mean-pool contribution of this row tile.
        @pl.when(k == n_hops - 1)
        def _():
            hw = jnp.maximum(acc_ref[...] + b_ref[...], 0.0)
            o_ref[...] += jnp.dot(p_ref[...], hw.astype(jnp.bfloat16),
                                  preferred_element_type=jnp.float32)


def subgcn_feature(x, edge_index, batch, weight, bias, num_graphs, *,
                   force_stream=False):
    """Pallas implementation of SubGcnFeature.forward.

    x:          [N, C_in] float32 node features
    edge_index: [2, E]    int32 COO edges (directed pairs, as in PyG)
    batch:      [N]       int32 graph assignment per node
    weight:     [C_in, H] float32
    bias:       [H]       float32
    returns:    [G, H]    float32 per-graph pooled features
    """
    n, _ = x.shape
    hidden = weight.shape[1]

    # --- glue: dense symmetric-normalized adjacency with self-loops (gcn_norm)
    row, col = edge_index[0], edge_index[1]
    adj = jnp.zeros((n, n), jnp.float32).at[row, col].add(1.0)
    adj = adj + jnp.eye(n, dtype=jnp.float32)
    deg = jnp.sum(adj, axis=1)
    d_inv_sqrt = jnp.where(deg > 0, 1.0 / jnp.sqrt(deg), 0.0)
    s = d_inv_sqrt[:, None] * adj * d_inv_sqrt[None, :]

    # --- glue: mean-pool matrix P [G, N], P[g, i] = [batch[i]==g] / count(g)
    one_hot = (batch[None, :] == jnp.arange(num_graphs, dtype=batch.dtype)[:, None])
    one_hot = one_hot.astype(jnp.float32)
    counts = jnp.maximum(jnp.sum(one_hot, axis=1, keepdims=True), 1.0)
    pool = one_hot / counts

    # --- pre-apply the linear weight (SGConv is associative in W) -----------
    h0 = x.astype(jnp.float32) @ weight.astype(jnp.float32)     # [N, H]

    # --- padding / tiling: N padded to a multiple of 512 => tile always 512 --
    tile = 512
    n_pad = _round_up(max(n, 1), tile)
    n_tiles = n_pad // tile
    h_pad = _round_up(hidden, 128)            # lane-dense propagated width
    g_pad = _round_up(num_graphs, 8)

    s_p = (jnp.zeros((n_pad, n_pad), jnp.float32).at[:n, :n].set(s)
           ).astype(jnp.bfloat16)
    h0_p = (jnp.zeros((n_pad, h_pad), jnp.float32).at[:n, :hidden].set(h0)
            ).astype(jnp.bfloat16)
    p_p = (jnp.zeros((num_graphs, n_pad), jnp.float32).at[:, :n].set(pool)
           ).astype(jnp.bfloat16)
    b_p = jnp.zeros((1, h_pad), jnp.float32).at[0, :hidden].set(
        bias.astype(jnp.float32))

    # --- generation-aware VMEM budget & S-residency decision -----------------
    try:
        phys_vmem = int(pltpu.get_tpu_info().vmem_capacity_bytes)
    except Exception:
        phys_vmem = 64 * 2**20                 # conservative (v7x-sized) fallback

    est_common = (
        2 * tile * h_pad * 2                   # streamed h0 blocks (bf16, x2 bufs)
        + 2 * g_pad * tile * 2                 # streamed P blocks (bf16, x2 bufs)
        + 2 * 8 * h_pad * 4                    # bias blocks
        + 2 * g_pad * h_pad * 4                # resident pooled-output block
        + 2 * n_pad * h_pad * 2                # h ping-pong scratch (bf16)
        + tile * h_pad * 4                     # f32 row-tile accumulator
    )
    est_resident = est_common + n_pad * n_pad * 2        # S resident, single copy
    est_stream = est_common + 2 * tile * tile * 2        # S streamed, x2 bufs

    s_resident = (not force_stream) and (
        est_resident + (4 << 20) <= int(0.65 * phys_vmem))

    est = est_resident if s_resident else est_stream
    vmem_limit = int(min(int(0.85 * phys_vmem), max(est + (4 << 20), 16 << 20)))

    kernel = functools.partial(_subgcn_kernel, tile=tile, n_col=n_tiles,
                               n_hops=K_HOPS, s_resident=s_resident)

    if s_resident:
        # Whole S lives in VMEM, fetched from HBM exactly once.
        s_spec = pl.BlockSpec(memory_space=pltpu.MemorySpace.VMEM)
    else:
        # Streamed (tile, tile) blocks, auto double-buffered by the pipeline.
        s_spec = pl.BlockSpec((tile, tile), lambda k, i, j: (i, j))

    grid_spec = pltpu.PrefetchScalarGridSpec(
        num_scalar_prefetch=0,
        grid=(K_HOPS, n_tiles, n_tiles),
        in_specs=[
            s_spec,
            # h0 streams only during (k==0, i==0); afterwards pin to block 0 so
            # the pipeline stops re-fetching it.
            pl.BlockSpec((tile, h_pad),
                         lambda k, i, j: (jnp.where((k == 0) & (i == 0), j, 0), 0)),
            pl.BlockSpec((1, h_pad), lambda k, i, j: (0, 0)),          # bias
            pl.BlockSpec((num_graphs, tile), lambda k, i, j: (0, i)),  # P slice
        ],
        out_specs=pl.BlockSpec((num_graphs, h_pad), lambda k, i, j: (0, 0)),
        scratch_shapes=[
            pltpu.VMEM((2, n_pad, h_pad), jnp.bfloat16),   # h ping-pong
            pltpu.VMEM((tile, h_pad), jnp.float32),        # row-tile accumulator
        ],
    )

    out = pl.pallas_call(
        kernel,
        out_shape=jax.ShapeDtypeStruct((num_graphs, h_pad), jnp.float32),
        grid_spec=grid_spec,
        compiler_params=pltpu.CompilerParams(
            dimension_semantics=("arbitrary", "arbitrary", "arbitrary"),
            vmem_limit_bytes=vmem_limit,
        ),
    )(s_p, h0_p, b_p, p_p)

    return out[:, :hidden]


def _reference(x, edge_index, batch, weight, bias, num_graphs):
    """Plain-JAX f32 reference of SGConv(K=3) + ReLU + global_mean_pool."""
    n = x.shape[0]
    row, col = edge_index[0], edge_index[1]
    adj = jnp.zeros((n, n), jnp.float32).at[row, col].add(1.0)
    adj = adj + jnp.eye(n, dtype=jnp.float32)
    deg = jnp.sum(adj, axis=1)
    d_inv_sqrt = jnp.where(deg > 0, 1.0 / jnp.sqrt(deg), 0.0)
    s = d_inv_sqrt[:, None] * adj * d_inv_sqrt[None, :]
    h = x
    for _ in range(K_HOPS):
        h = s @ h
    h = jax.nn.relu(h @ weight + bias[None, :])
    one_hot = (batch[None, :] == jnp.arange(num_graphs)[:, None]).astype(jnp.float32)
    counts = jnp.maximum(jnp.sum(one_hot, axis=1, keepdims=True), 1.0)
    return (one_hot / counts) @ h


if __name__ == "__main__":
    key = jax.random.PRNGKey(0)
    k_x, k_e, k_w, k_b = jax.random.split(key, 4)

    # Small shapes: N=16 nodes, C_in=4 features, hidden=32, G=2 graphs, E=48 edges.
    N, C_IN, HIDDEN, G, E = 16, 4, 32, 2, 48

    x = jax.random.normal(k_x, (N, C_IN), dtype=jnp.float32)
    edge_index = jax.random.randint(k_e, (2, E), 0, N, dtype=jnp.int32)
    batch = jnp.concatenate(
        [jnp.zeros((N // 2,), jnp.int32), jnp.ones((N - N // 2,), jnp.int32)]
    )

    # Deterministic SGConv parameters (Linear(c_in -> hidden, bias=True)).
    weight = jax.random.normal(k_w, (C_IN, HIDDEN), dtype=jnp.float32) * 0.1
    bias = jax.random.normal(k_b, (HIDDEN,), dtype=jnp.float32) * 0.1

    ref = _reference(x, edge_index, batch, weight, bias, G)

    # Exercise both the resident-S path and the streaming-S fallback.
    out_resident = jax.block_until_ready(
        subgcn_feature(x, edge_index, batch, weight, bias, G))
    out_streamed = jax.block_until_ready(
        subgcn_feature(x, edge_index, batch, weight, bias, G, force_stream=True))

    assert out_resident.shape == (G, HIDDEN)
    assert out_streamed.shape == (G, HIDDEN)
    # bf16 propagation (f32 accumulation) => slightly looser tolerance than f32.
    assert jnp.allclose(out_resident, ref, atol=2e-2, rtol=2e-2), "resident-S mismatch"
    assert jnp.allclose(out_streamed, ref, atol=2e-2, rtol=2e-2), "streamed-S mismatch"

    print("KERNEL_OK")
</pallas_src>

<mosaic_0001>
module attributes {stable_mosaic.version = 11 : i64} {
  func.func @_subgcn_kernel(%arg0: i32, %arg1: i32, %arg2: i32, %arg3: memref<512x512xbf16, #tpu.memory_space<vmem>>, %arg4: memref<512x128xbf16, #tpu.memory_space<vmem>>, %arg5: memref<1x128xf32, #tpu.memory_space<vmem>>, %arg6: memref<2x512xbf16, #tpu.memory_space<vmem>>, %arg7: memref<2x128xf32, #tpu.memory_space<vmem>>, %arg8: memref<2x512x128xbf16, #tpu.memory_space<vmem>>, %arg9: memref<512x128xf32, #tpu.memory_space<vmem>>) attributes {dimension_semantics = [#tpu.dimension_semantics<arbitrary>, #tpu.dimension_semantics<arbitrary>, #tpu.dimension_semantics<arbitrary>], iteration_bounds = array<i64: 3, 1, 1>, scalar_prefetch = 0 : i64, scratch_operands = 2 : i64, tpu.core_type = #tpu.core_type<tc>, window_params = [{pipeline_mode = #tpu.pipeline_mode<synchronous>, transform_indices = @transform_0, window_bounds = array<i64: 512, 512>}, {transform_indices = @transform_1, window_bounds = array<i64: 512, 128>}, {pipeline_mode = #tpu.pipeline_mode<synchronous>, transform_indices = @transform_2, window_bounds = array<i64: 1, 128>}, {transform_indices = @transform_3, window_bounds = array<i64: 2, 512>}, {pipeline_mode = #tpu.pipeline_mode<synchronous>, transform_indices = @transform_4, window_bounds = array<i64: 2, 128>}]} {
    %c512_i32 = arith.constant 512 : i32
    %0 = arith.muli %arg1, %c512_i32 : i32
    %1 = tpu.assume_multiple %0, 512 : i32
    %c512_i32_0 = arith.constant 512 : i32
    %2 = arith.muli %arg2, %c512_i32_0 : i32
    %3 = tpu.assume_multiple %2, 512 : i32
    %c0_i32 = arith.constant 0 : i32
    %4 = arith.cmpi eq, %arg0, %c0_i32 : i32
    %c0_i32_1 = arith.constant 0 : i32
    %5 = arith.cmpi eq, %arg1, %c0_i32_1 : i32
    %6 = arith.andi %4, %5 : i1
    %c0_i32_2 = arith.constant 0 : i32
    %7 = arith.cmpi eq, %arg2, %c0_i32_2 : i32
    %8 = arith.andi %6, %7 : i1
    %9 = arith.extui %8 : i1 to i32
    %c0_i32_3 = arith.constant 0 : i32
    %10 = arith.cmpi ne, %9, %c0_i32_3 : i32
    scf.if %10 {
      %cst_24 = arith.constant 0.000000e+00 : f32
      %54 = vector.broadcast %cst_24 : f32 to vector<2x128xf32>
      %c0_25 = arith.constant 0 : index
      %c0_26 = arith.constant 0 : index
      %55 = vector.load %arg7[%c0_25, %c0_26] : memref<2x128xf32, #tpu.memory_space<vmem>>, vector<2x128xf32>
      tpu.vector_store %arg7[%c0_25, %c0_26], %54 {strides = array<i32>} : memref<2x128xf32, #tpu.memory_space<vmem>>, vector<2x128xf32>,
    } else {
    }
    %c0_i32_4 = arith.constant 0 : i32
    %11 = arith.cmpi eq, %arg0, %c0_i32_4 : i32
    %c0_i32_5 = arith.constant 0 : i32
    %12 = arith.cmpi eq, %arg1, %c0_i32_5 : i32
    %13 = arith.andi %11, %12 : i1
    %14 = arith.extui %13 : i1 to i32
    %c0_i32_6 = arith.constant 0 : i32
    %15 = arith.cmpi ne, %14, %c0_i32_6 : i32
    scf.if %15 {
      %c0_24 = arith.constant 0 : index
      %c0_25 = arith.constant 0 : index
      %54 = vector.load %arg4[%c0_24, %c0_25] : memref<512x128xbf16, #tpu.memory_space<vmem>>, vector<512x128xbf16>
      %c1 = arith.constant 1 : index
      %55 = arith.index_cast %3 : i32 to index
      %c0_26 = arith.constant 0 : index
      %56 = vector.load %arg8[%c1, %55, %c0_26] : memref<2x512x128xbf16, #tpu.memory_space<vmem>>, vector<1x512x128xbf16>
      %57 = vector.shape_cast %56 : vector<1x512x128xbf16> to vector<512x128xbf16>
      %58 = vector.shape_cast %54 : vector<512x128xbf16> to vector<1x512x128xbf16>
      tpu.vector_store %arg8[%c1, %55, %c0_26], %58 {strides = array<i32>} : memref<2x512x128xbf16, #tpu.memory_space<vmem>>, vector<1x512x128xbf16>,
    } else {
    }
    %c1_i32 = arith.constant 1 : i32
    %16 = arith.addi %arg0, %c1_i32 : i32
    %c2_i32 = arith.constant 2 : i32
    %c0_i32_7 = arith.constant 0 : i32
    %17 = arith.cmpi eq, %c2_i32, %c0_i32_7 : i32
    %c1_i32_8 = arith.constant 1 : i32
    %18 = arith.select %17, %c1_i32_8, %c2_i32 : i32
    %19 = arith.remsi %16, %18 : i32
    %c0_i32_9 = arith.constant 0 : i32
    %20 = arith.cmpi ne, %19, %c0_i32_9 : i32
    %c0_i32_10 = arith.constant 0 : i32
    %21 = arith.cmpi slt, %19, %c0_i32_10 : i32
    %c0_i32_11 = arith.constant 0 : i32
    %22 = arith.cmpi slt, %18, %c0_i32_11 : i32
    %23 = arith.xori %21, %22 : i1
    %24 = arith.andi %23, %20 : i1
    %25 = arith.addi %19, %18 : i32
    %26 = arith.select %24, %25, %19 : i32
    %c2_i32_12 = arith.constant 2 : i32
    %c0_i32_13 = arith.constant 0 : i32
    %27 = arith.cmpi eq, %c2_i32_12, %c0_i32_13 : i32
    %c1_i32_14 = arith.constant 1 : i32
    %28 = arith.select %27, %c1_i32_14, %c2_i32_12 : i32
    %29 = arith.remsi %arg0, %28 : i32
    %c0_i32_15 = arith.constant 0 : i32
    %30 = arith.cmpi ne, %29, %c0_i32_15 : i32
    %c0_i32_16 = arith.constant 0 : i32
    %31 = arith.cmpi slt, %29, %c0_i32_16 : i32
    %c0_i32_17 = arith.constant 0 : i32
    %32 = arith.cmpi slt, %28, %c0_i32_17 : i32
    %33 = arith.xori %31, %32 : i1
    %34 = arith.andi %33, %30 : i1
    %35 = arith.addi %29, %28 : i32
    %36 = arith.select %34, %35, %29 : i32
    %37 = arith.index_cast %1 : i32 to index
    %38 = arith.index_cast %3 : i32 to index
    %39 = vector.load %arg3[%37, %38] : memref<512x512xbf16, #tpu.memory_space<vmem>>, vector<512x512xbf16>
    %40 = arith.index_cast %26 : i32 to index
    %41 = arith.index_cast %3 : i32 to index
    %c0 = arith.constant 0 : index
    %42 = vector.load %arg8[%40, %41, %c0] : memref<2x512x128xbf16, #tpu.memory_space<vmem>>, vector<1x512x128xbf16>
    %43 = vector.shape_cast %42 : vector<1x512x128xbf16> to vector<512x128xbf16>
    %cst = arith.constant dense<0.000000e+00> : vector<512x128xf32>
    %44 = tpu.matmul %39, %43, %cst {dimension_numbers = #tpu.dot_dimension_numbers<[1], [0], [0], [1], [0, 0, 1, 1], [], []>} : vector<512x512xbf16>, vector<512x128xbf16>, vector<512x128xf32> -> vector<512x128xf32>
    %c0_i32_18 = arith.constant 0 : i32
    %45 = arith.cmpi eq, %arg2, %c0_i32_18 : i32
    %46 = arith.extui %45 : i1 to i32
    %c0_i32_19 = arith.constant 0 : i32
    %47 = arith.cmpi ne, %46, %c0_i32_19 : i32
    scf.if %47 {
      %c0_24 = arith.constant 0 : index
      %c0_25 = arith.constant 0 : index
      %54 = vector.load %arg9[%c0_24, %c0_25] : memref<512x128xf32, #tpu.memory_space<vmem>>, vector<512x128xf32>
      tpu.vector_store %arg9[%c0_24, %c0_25], %44 {strides = array<i32>} : memref<512x128xf32, #tpu.memory_space<vmem>>, vector<512x128xf32>,
    } else {
    }
    %c0_i32_20 = arith.constant 0 : i32
    %48 = arith.cmpi sgt, %arg2, %c0_i32_20 : i32
    %49 = arith.extui %48 : i1 to i32
    %c0_i32_21 = arith.constant 0 : i32
    %50 = arith.cmpi ne, %49, %c0_i32_21 : i32
    scf.if %50 {
      %c0_24 = arith.constant 0 : index
      %c0_25 = arith.constant 0 : index
      %54 = vector.load %arg9[%c0_24, %c0_25] : memref<512x128xf32, #tpu.memory_space<vmem>>, vector<512x128xf32>
      %55 = arith.addf %54, %44 : vector<512x128xf32>
      %c0_26 = arith.constant 0 : index
      %c0_27 = arith.constant 0 : index
      %56 = vector.load %arg9[%c0_26, %c0_27] : memref<512x128xf32, #tpu.memory_space<vmem>>, vector<512x128xf32>
      tpu.vector_store %arg9[%c0_26, %c0_27], %55 {strides = array<i32>} : memref<512x128xf32, #tpu.memory_space<vmem>>, vector<512x128xf32>,
    } else {
    }
    %c0_i32_22 = arith.constant 0 : i32
    %51 = arith.cmpi eq, %arg2, %c0_i32_22 : i32
    %52 = arith.extui %51 : i1 to i32
    %c0_i32_23 = arith.constant 0 : i32
    %53 = arith.cmpi ne, %52, %c0_i32_23 : i32
    scf.if %53 {
      %c2_i32_24 = arith.constant 2 : i32
      %54 = arith.cmpi slt, %arg0, %c2_i32_24 : i32
      %55 = arith.extui %54 : i1 to i32
      %c0_i32_25 = arith.constant 0 : i32
      %56 = arith.cmpi ne, %55, %c0_i32_25 : i32
      scf.if %56 {
        %c0_28 = arith.constant 0 : index
        %c0_29 = arith.constant 0 : index
        %60 = vector.load %arg9[%c0_28, %c0_29] : memref<512x128xf32, #tpu.memory_space<vmem>>, vector<512x128xf32>
        %61 = arith.truncf %60 : vector<512x128xf32> to vector<512x128xbf16>
        %62 = arith.index_cast %36 : i32 to index
        %63 = arith.index_cast %1 : i32 to index
        %c0_30 = arith.constant 0 : index
        %64 = vector.load %arg8[%62, %63, %c0_30] : memref<2x512x128xbf16, #tpu.memory_space<vmem>>, vector<1x512x128xbf16>
        %65 = vector.shape_cast %64 : vector<1x512x128xbf16> to vector<512x128xbf16>
        %66 = vector.shape_cast %61 : vector<512x128xbf16> to vector<1x512x128xbf16>
        tpu.vector_store %arg8[%62, %63, %c0_30], %66 {strides = array<i32>} : memref<2x512x128xbf16, #tpu.memory_space<vmem>>, vector<1x512x128xbf16>,
      } else {
      }
      %c2_i32_26 = arith.constant 2 : i32
      %57 = arith.cmpi eq, %arg0, %c2_i32_26 : i32
      %58 = arith.extui %57 : i1 to i32
      %c0_i32_27 = arith.constant 0 : i32
      %59 = arith.cmpi ne, %58, %c0_i32_27 : i32
      scf.if %59 {
        %c0_28 = arith.constant 0 : index
        %c0_29 = arith.constant 0 : index
        %60 = vector.load %arg9[%c0_28, %c0_29] : memref<512x128xf32, #tpu.memory_space<vmem>>, vector<512x128xf32>
        %c0_30 = arith.constant 0 : index
        %c0_31 = arith.constant 0 : index
        %61 = vector.load %arg5[%c0_30, %c0_31] : memref<1x128xf32, #tpu.memory_space<vmem>>, vector<1x128xf32>
        %62 = vector.broadcast %61 : vector<1x128xf32> to vector<512x128xf32>
        %63 = arith.addf %60, %62 : vector<512x128xf32>
        %cst_32 = arith.constant 0.000000e+00 : f32
        %64 = vector.broadcast %cst_32 : f32 to vector<512x128xf32>
        %65 = arith.maximumf %63, %64 : vector<512x128xf32>
        %c0_33 = arith.constant 0 : index
        %c0_34 = arith.constant 0 : index
        %66 = vector.load %arg7[%c0_33, %c0_34] : memref<2x128xf32, #tpu.memory_space<vmem>>, vector<2x128xf32>
        %c0_35 = arith.constant 0 : index
        %c0_36 = arith.constant 0 : index
        %67 = vector.load %arg6[%c0_35, %c0_36] : memref<2x512xbf16, #tpu.memory_space<vmem>>, vector<2x512xbf16>
        %68 = arith.truncf %65 : vector<512x128xf32> to vector<512x128xbf16>
        %cst_37 = arith.constant dense<0.000000e+00> : vector<2x128xf32>
        %69 = tpu.matmul %67, %68, %cst_37 {dimension_numbers = #tpu.dot_dimension_numbers<[1], [0], [0], [1], [0, 0, 1, 1], [], []>} : vector<2x512xbf16>, vector<512x128xbf16>, vector<2x128xf32> -> vector<2x128xf32>
        %70 = arith.addf %66, %69 : vector<2x128xf32>
        %c0_38 = arith.constant 0 : index
        %c0_39 = arith.constant 0 : index
        %71 = vector.load %arg7[%c0_38, %c0_39] : memref<2x128xf32, #tpu.memory_space<vmem>>, vector<2x128xf32>
        tpu.vector_store %arg7[%c0_38, %c0_39], %70 {strides = array<i32>} : memref<2x128xf32, #tpu.memory_space<vmem>>, vector<2x128xf32>,
      } else {
      }
    } else {
    }
    return
  }
  func.func @transform_0(%arg0: i32, %arg1: i32, %arg2: i32) -> (i32, i32) {
    %c0_i32 = arith.constant 0 : i32
    %c0_i32_0 = arith.constant 0 : i32
    %c0_i32_1 = arith.constant 0 : i32
    return %c0_i32, %c0_i32_0 : i32, i32
  }
  func.func @transform_1(%arg0: i32, %arg1: i32, %arg2: i32) -> (i32, i32) {
    %c0_i32 = arith.constant 0 : i32
    %0 = arith.cmpi eq, %arg0, %c0_i32 : i32
    %c0_i32_0 = arith.constant 0 : i32
    %1 = arith.cmpi eq, %arg1, %c0_i32_0 : i32
    %2 = arith.andi %0, %1 : i1
    %c0_i32_1 = arith.constant 0 : i32
    %3 = arith.select %2, %arg2, %c0_i32_1 : i32
    %c0_i32_2 = arith.constant 0 : i32
    %c0_i32_3 = arith.constant 0 : i32
    return %3, %c0_i32_2 : i32, i32
  }
  func.func @transform_2(%arg0: i32, %arg1: i32, %arg2: i32) -> (i32, i32) {
    %c0_i32 = arith.constant 0 : i32
    %c0_i32_0 = arith.constant 0 : i32
    %c0_i32_1 = arith.constant 0 : i32
    return %c0_i32, %c0_i32_0 : i32, i32
  }
  func.func @transform_3(%arg0: i32, %arg1: i32, %arg2: i32) -> (i32, i32) {
    %c0_i32 = arith.constant 0 : i32
    %c0_i32_0 = arith.constant 0 : i32
    return %c0_i32, %arg1 : i32, i32
  }
  func.func @transform_4(%arg0: i32, %arg1: i32, %arg2: i32) -> (i32, i32) {
    %c0_i32 = arith.constant 0 : i32
    %c0_i32_0 = arith.constant 0 : i32
    %c0_i32_1 = arith.constant 0 : i32
    return %c0_i32, %c0_i32_0 : i32, i32
  }
}

</mosaic_0001>

<bundles_post_ra>
// kernel: tpu_custom_call.1
= control target key start
LH: loop header
LB: loop body
LE: loop exit
PB: predicated region body
PF: predicated region fallthrough
CT: control target
= control target key end

     0   :  { %9 = vsyncpa [#allocation5], 0  ;;  %s4526_s0 = inlined_call_operand.hbm [shape: bf16[512,512], index: 0, kind: input, shape index: {}]   ;;  %s4527_s1 = inlined_call_operand.hbm [shape: bf16[512,128], index: 1, kind: input, shape index: {}]   ;;  %s4528_s2 = inlined_call_operand.vmem [shape: f32[1,128], index: 2, kind: input, shape index: {}]   ;;  %s4529_s3 = inlined_call_operand.vmem [shape: bf16[2,512], index: 3, kind: input, shape index: {}]   ;;  %s4530_s4 = inlined_call_operand.hbm [shape: f32[2,128], index: 4, kind: output, shape index: {}]  }
   0x1   :  { %10 = vsyncpa [#allocation8], 0 }
   0x2   :  { %12 = vsyncpa [#allocation8 + $0x1], 0 }
   0x3   :  { %13 = vsyncpa [#allocation6], 0  ;;  %s4239_s15 = smov 0   ;;  %s4241_s16 = smov 0  }
   0x4   :  { %s4243_s17 = smov 0  }
   0x5 LB: > { %s3181_s18 = sadd.s32 4294967295, %s4202_s17   ;;  %s38_s19 = sadd.s32 1, %s4198_s16  ;;  %s4202_s17 = sphi %s4243_s17, %s19_s17   ;;  %s4198_s16 = sphi %s4241_s16, %s4537_s16   ;;  %s4194_s15 = sphi %s4239_s15, %s4536_s15  }
   0x6   : > { %p40_p0 = scmp.ge.s32.totalorder %s38_s19, 3  ;;  %p3184_p1 = scmp.ge.s32.totalorder %s4202_s17, 1 }
   0x7   : > { %p168_p2 = scmp.lt.s32.totalorder %s4202_s17, 4  ;;  %p4266_p4 = scmp.eq.s32.totalorder %s3181_s18, 0 }
   0x8   : > { %s4539_s19 = smov (%p40_p0, %s38_s19), 0  ;;  %s4204_s22 = smov [#allocation4]  }
   0x9   : > { %p4260_p3 = pnand %p3184_p1, %p168_p2  ;;  %s180_s23 = sshll.u32 %s4204_s22, 4  ;;  %s181_s23 = int_to_ptr.vmem [resolvable:$true] %s180_s23 }
   0xa   : > { %p3828_p7 = scmp.lt.s32.totalorder %s4202_s17, 3  ;;  %p3829_p8 = scmp.eq.s32.totalorder %s4202_s17, 0 }
   0xb   : > { %p3819_p5 = pneg %p4260_p3  ;;  %s4103_s25 = scalar_lea.vmem %s181_s23, 16384 }
   0xc   : > { %p4104_p10 = scmp.ne.s32.totalorder %s181_s23, %s4103_s25  ;;  %p4111_p13 = scmp.lt.s32.totalorder %s181_s23, %s181_s23 }
   0xd   : > { %p4274_p6 = pnand %p4266_p4, %p3819_p5  ;;  %p4112_p0 = scmp.lt.s32.totalorder %s4103_s25, %s4103_s25 }
   0xf   : > { %p4094_p9 = pneg %p4274_p6  ;;  %p4113_p1 = por %p4112_p0, %p4111_p13 }
  0x11   : > { %p4106_p11 = pnand %p4104_p10, %p4094_p9 }
  0x13   : > { %p4107_p12 = pneg %p4106_p11 }
  0x15   : > { %p4114_p2 = pnand %p4113_p1, %p4107_p12 }
  0x17   : > { %4117 = shalt.err (!%p4114_p2)
}
  0x18   : > { %s4205_s26 = smov 256   ;;  %s4206_s27 = smov 16  }
  0x19   : > { %3822 = dma.hbm_to_vmem [thread:$0]  (!%p4274_p6), %s4526_s0, 16384, %s181_s23, [#allocation5], %s4205_s26, %s4205_s26, %s4206_s27  }
  0x1a   : > { %p4291_p5 = pnand %p3829_p8, %p3828_p7  ;;  %s4207_s5 = smov [#allocation7]  }
  0x1b   : > { %s221_s6 = sshll.u32 %s4207_s5, 4  ;;  %s222_s6 = int_to_ptr.vmem [resolvable:$true] %s221_s6 }
  0x1c   : > { %p4120_p9 = pneg %p4291_p5  ;;  %s4129_s7 = scalar_lea.vmem %s222_s6, 4096 }
  0x1d   : > { %p4130_p10 = scmp.ne.s32.totalorder %s222_s6, %s4129_s7  ;;  %s4136_s8 = scalar_lea.vmem %s222_s6, 8192 }
  0x1e   : > { %p4137_p13 = scmp.lt.s32.totalorder %s222_s6, %s222_s6  ;;  %p4138_p0 = scmp.lt.s32.totalorder %s4136_s8, %s4129_s7 }
  0x1f   : > { %p4132_p11 = pnand %p4130_p10, %p4120_p9 }
  0x20   : > { %p4139_p6 = por %p4138_p0, %p4137_p13 }
  0x21   : > { %p4133_p12 = pneg %p4132_p11 }
  0x23   : > { %p4140_p1 = pnand %p4139_p6, %p4133_p12 }
  0x25   : > { %4143 = shalt.err (!%p4140_p1)
}
  0x26   : > { %s4208_s9 = smov 64   ;;  %s4209_s10 = smov 4  }
  0x27   : > { %3826 = dma.hbm_to_vmem [thread:$0]  (!%p4291_p5), %s4527_s1, 4096, %s222_s6, [#allocation8], %s4208_s9, %s4208_s9, %s4209_s10  }
  0x28   : > { %233 = sbr.rel (%p4260_p3) target bundleno = 899 (0x383), region = 36 }
  0x2d   : > { %4181 = dma.done.wait (%p4266_p4), [#allocation5], 16384  }
  0x2e   : > { %4183 = vsyncadd (%p4266_p4), [#allocation5], 4294950912 }
  0x2f   : > { %4185 = dma.done.wait (%p4266_p4), [#allocation8], 4096  }
  0x30   : > { %4187 = vsyncadd (%p4266_p4), [#allocation8], 4294963200  ;;  %p281_p7 = scmp.eq.s32.totalorder %s4194_s15, 0 }
  0x31   : > { %v4210_v0 = vmov (%p281_p7), 0.0  }
  0x32   : > { %289 = sbr.rel (!%p281_p7) target bundleno = 55 (0x37), region = 48  ;;  %290 = vst [vmem:[#allocation9] sm:$0x3] (%p281_p7), %v4210_v0 }
  0x37 PF: > { %292 = sbr.rel (!%p281_p7) target bundleno = 72 (0x48), region = 52  ;;  %v293_v1 = vld [vmem:[#allocation7] sm:$0xff] (%p281_p7)   ;;  %v295_v2 = vld [vmem:[#allocation7 + $0x8] sm:$0xff] (%p281_p7)   ;;  %v297_v3 = vld [vmem:[#allocation7 + $0x10] sm:$0xff] (%p281_p7)  }
  0x38   : > { %3195 = vst [vmem:[#allocation2 + $0x100] sm:$0xff] (%p281_p7), %v293_v1   ;;  %3197 = vst [vmem:[#allocation2 + $0x108] sm:$0xff] (%p281_p7), %v295_v2   ;;  %v299_v4 = vld [vmem:[#allocation7 + $0x18] sm:$0xff] (%p281_p7)   ;;  %v301_v5 = vld [vmem:[#allocation7 + $0x20] sm:$0xff] (%p281_p7)  }
  0x39   : > { %3199 = vst [vmem:[#allocation2 + $0x110] sm:$0xff] (%p281_p7), %v297_v3   ;;  %v303_v6 = vld [vmem:[#allocation7 + $0x28] sm:$0xff] (%p281_p7)   ;;  %3201 = vst [vmem:[#allocation2 + $0x118] sm:$0xff] (%p281_p7), %v299_v4   ;;  %v305_v7 = vld [vmem:[#allocation7 + $0x30] sm:$0xff] (%p281_p7)  }
  0x3a   : > { %3203 = vst [vmem:[#allocation2 + $0x120] sm:$0xff] (%p281_p7), %v301_v5   ;;  %3205 = vst [vmem:[#allocation2 + $0x128] sm:$0xff] (%p281_p7), %v303_v6   ;;  %v307_v8 = vld [vmem:[#allocation7 + $0x38] sm:$0xff] (%p281_p7)   ;;  %v309_v9 = vld [vmem:[#allocation7 + $0x40] sm:$0xff] (%p281_p7)  }
  0x3b   : > { %3207 = vst [vmem:[#allocation2 + $0x130] sm:$0xff] (%p281_p7), %v305_v7   ;;  %3209 = vst [vmem:[#allocation2 + $0x138] sm:$0xff] (%p281_p7), %v307_v8   ;;  %v311_v10 = vld [vmem:[#allocation7 + $0x48] sm:$0xff] (%p281_p7)   ;;  %v313_v11 = vld [vmem:[#allocation7 + $0x50] sm:$0xff] (%p281_p7)  }
  0x3c   : > { %3211 = vst [vmem:[#allocation2 + $0x140] sm:$0xff] %v309_v9   ;;  %v315_v12 = vld [vmem:[#allocation7 + $0x58] sm:$0xff]   ;;  %3213 = vst [vmem:[#allocation2 + $0x148] sm:$0xff] %v311_v10   ;;  %v317_v13 = vld [vmem:[#allocation7 + $0x60] sm:$0xff]  }
  0x3d   : > { %3215 = vst [vmem:[#allocation2 + $0x150] sm:$0xff] %v313_v11   ;;  %3217 = vst [vmem:[#allocation2 + $0x158] sm:$0xff] %v315_v12   ;;  %v319_v14 = vld [vmem:[#allocation7 + $0x68] sm:$0xff]   ;;  %v321_v15 = vld [vmem:[#allocation7 + $0x70] sm:$0xff]  }
  0x3e   : > { %3219 = vst [vmem:[#allocation2 + $0x160] sm:$0xff] %v317_v13   ;;  %3221 = vst [vmem:[#allocation2 + $0x168] sm:$0xff] %v319_v14   ;;  %v323_v16 = vld [vmem:[#allocation7 + $0x78] sm:$0xff]   ;;  %v325_v17 = vld [vmem:[#allocation7 + $0x80] sm:$0xff]  }
  0x3f   : > { %3223 = vst [vmem:[#allocation2 + $0x170] sm:$0xff] %v321_v15   ;;  %v327_v18 = vld [vmem:[#allocation7 + $0x88] sm:$0xff]   ;;  %3225 = vst [vmem:[#allocation2 + $0x178] sm:$0xff] %v323_v16   ;;  %v329_v19 = vld [vmem:[#allocation7 + $0x90] sm:$0xff]  }
  0x40   : > { %3227 = vst [vmem:[#allocation2 + $0x180] sm:$0xff] %v325_v17   ;;  %3229 = vst [vmem:[#allocation2 + $0x188] sm:$0xff] %v327_v18   ;;  %v331_v20 = vld [vmem:[#allocation7 + $0x98] sm:$0xff]   ;;  %v333_v21 = vld [vmem:[#allocation7 + $0xa0] sm:$0xff]  }
  0x41   : > { %3231 = vst [vmem:[#allocation2 + $0x190] sm:$0xff] %v329_v19   ;;  %3233 = vst [vmem:[#allocation2 + $0x198] sm:$0xff] %v331_v20   ;;  %v335_v22 = vld [vmem:[#allocation7 + $0xa8] sm:$0xff]   ;;  %v337_v23 = vld [vmem:[#allocation7 + $0xb0] sm:$0xff]  }
  0x42   : > { %3235 = vst [vmem:[#allocation2 + $0x1a0] sm:$0xff] %v333_v21   ;;  %v339_v24 = vld [vmem:[#allocation7 + $0xb8] sm:$0xff]   ;;  %3237 = vst [vmem:[#allocation2 + $0x1a8] sm:$0xff] %v335_v22   ;;  %v341_v25 = vld [vmem:[#allocation7 + $0xc0] sm:$0xff]  }
  0x43   : > { %3239 = vst [vmem:[#allocation2 + $0x1b0] sm:$0xff] %v337_v23   ;;  %3241 = vst [vmem:[#allocation2 + $0x1b8] sm:$0xff] %v339_v24   ;;  %v343_v26 = vld [vmem:[#allocation7 + $0xc8] sm:$0xff]   ;;  %v345_v27 = vld [vmem:[#allocation7 + $0xd0] sm:$0xff]  }
  0x44   : > { %3243 = vst [vmem:[#allocation2 + $0x1c0] sm:$0xff] %v341_v25   ;;  %3245 = vst [vmem:[#allocation2 + $0x1c8] sm:$0xff] %v343_v26   ;;  %v347_v28 = vld [vmem:[#allocation7 + $0xd8] sm:$0xff]   ;;  %v349_v29 = vld [vmem:[#allocation7 + $0xe0] sm:$0xff]  }
  0x45   : > { %3247 = vst [vmem:[#allocation2 + $0x1d0] sm:$0xff] %v345_v27   ;;  %v351_v30 = vld [vmem:[#allocation7 + $0xe8] sm:$0xff]   ;;  %3249 = vst [vmem:[#allocation2 + $0x1d8] sm:$0xff] %v347_v28   ;;  %v353_v31 = vld [vmem:[#allocation7 + $0xf0] sm:$0xff]  }
  0x46   : > { %3251 = vst [vmem:[#allocation2 + $0x1e0] sm:$0xff] %v349_v29   ;;  %3253 = vst [vmem:[#allocation2 + $0x1e8] sm:$0xff] %v351_v30   ;;  %v355_v32 = vld [vmem:[#allocation7 + $0xf8] sm:$0xff]  }
  0x47   : > { %3255 = vst [vmem:[#allocation2 + $0x1f0] sm:$0xff] %v353_v31   ;;  %3257 = vst [vmem:[#allocation2 + $0x1f8] sm:$0xff] %v355_v32  }
  0x48 PF: > { %p439_p3 = scmp.lt.s32.totalorder %s4194_s15, 0  ;;  %s440_s13 = ssub.s32 0, %s4194_s15  ;;  %v4211_v33 = vmov 0   ;;  %v3902_v34 = vld [vmem:[#allocation4 + $0x4] ss:$16 sps:$4 sm:$0xff]  }
  0x49   : > { %s3262_s14 = smin.u32 %s4194_s15, %s440_s13  ;;  %1489 = vmatprep.subr.bf16.mxu0 %v4211_v33  ;;  %1778 = vmatprep.subr.bf16.mxu1 %v4211_v33  ;;  %s426_s20 = sadd.s32 1, %s4194_s15  ;;  %v3905_v35 = vld [vmem:[#allocation4 + $0xc] ss:$16 sps:$4 sm:$0xff]   ;;  %v3900_v4 = vld [vmem:[#allocation4] ss:$16 sps:$4 sm:$0xff]  }
  0x4a   : > { %s442_s21 = sand.u32 1, %s3262_s14   ;;  %s428_s23 = ssub.s32 0, %s426_s20  ;;  %1521 = vmatprep.mubr.bf16.mxu0 %v3902_v34  ;;  %1810 = vmatprep.mubr.bf16.mxu1 %v3905_v35  ;;  %v3903_v5 = vld [vmem:[#allocation4 + $0x8] ss:$16 sps:$4 sm:$0xff]   ;;  %v3906_v6 = vld [vmem:[#allocation4 + $0x24] ss:$16 sps:$4 sm:$0xff]  }
  0x4b   : > { %s443_s22 = ssub.s32 0, %s442_s21  ;;  %p427_p4 = scmp.lt.s32.totalorder %s426_s20, 0  ;;  %v3908_v7 = vld [vmem:[#allocation4 + $0x2c] ss:$16 sps:$4 sm:$0xff]   ;;  %v3910_v8 = vld [vmem:[#allocation4 + $0x20] ss:$16 sps:$4 sm:$0xff]  }
  0x4c   : > { %s4541_s22 = smov (!%p439_p3, %s443_s22), %s442_s21  ;;  %s3259_s24 = smin.u32 %s428_s23, %s426_s20  ;;  %v3911_v9 = vld [vmem:[#allocation4 + $0x28] ss:$16 sps:$4 sm:$0xff]   ;;  %v3912_v10 = vld [vmem:[#allocation4 + $0x44] ss:$16 sps:$4 sm:$0xff]   ;;  %v3914_v11 = vld [vmem:[#allocation4 + $0x4c] ss:$16 sps:$4 sm:$0xff]  }
  0x4d   : > { %p3264_p8 = scmp.lt.s32.totalorder %s4541_s22, 0  ;;  %s449_s25 = sadd.s32 2, %s4541_s22  ;;  %v3916_v12 = vld [vmem:[#allocation4 + $0x40] ss:$16 sps:$4 sm:$0xff]   ;;  %v3917_v13 = vld [vmem:[#allocation4 + $0x48] ss:$16 sps:$4 sm:$0xff]  }
  0x4e   : > { %s430_s26 = sand.u32 1, %s3259_s24   ;;  %v3918_v14 = vld [vmem:[#allocation4 + $0x64] ss:$16 sps:$4 sm:$0xff]   ;;  %v3920_v15 = vld [vmem:[#allocation4 + $0x6c] ss:$16 sps:$4 sm:$0xff]   ;;  %p3427_p5 = scmp.ge.s32.totalorder %s4194_s15, 2 }
  0x4f   : > { %s4543_s25 = smov (!%p3264_p8, %s449_s25), %s4541_s22  ;;  %s431_s27 = ssub.s32 0, %s430_s26  ;;  %v3922_v16 = vld [vmem:[#allocation4 + $0x60] ss:$16 sps:$4 sm:$0xff]   ;;  %v3923_v17 = vld [vmem:[#allocation4 + $0x68] ss:$16 sps:$4 sm:$0xff]  }
  0x50   : > { %s4545_s27 = smov (!%p427_p4, %s431_s27), %s430_s26  ;;  %v3924_v18 = vld [vmem:[#allocation4 + $0x84] ss:$16 sps:$4 sm:$0xff]   ;;  %v3926_v19 = vld [vmem:[#allocation4 + $0x8c] ss:$16 sps:$4 sm:$0xff]   ;;  %v3928_v20 = vld [vmem:[#allocation4 + $0x80] ss:$16 sps:$4 sm:$0xff]  }
  0x51   : > { %p3261_p2 = scmp.lt.s32.totalorder %s4545_s27, 0  ;;  %s437_s28 = sadd.s32 2, %s4545_s27  ;;  %v3929_v21 = vld [vmem:[#allocation4 + $0x88] ss:$16 sps:$4 sm:$0xff]   ;;  %v3930_v22 = vld [vmem:[#allocation4 + $0xa4] ss:$16 sps:$4 sm:$0xff]  }
  0x52   : > { %v3932_v23 = vld [vmem:[#allocation4 + $0xac] ss:$16 sps:$4 sm:$0xff]   ;;  %v3934_v24 = vld [vmem:[#allocation4 + $0xa0] ss:$16 sps:$4 sm:$0xff]   ;;  %v3935_v25 = vld [vmem:[#allocation4 + $0xa8] ss:$16 sps:$4 sm:$0xff]  }
  0x53   : > { %s4547_s28 = smov (!%p3261_p2, %s437_s28), %s4545_s27  ;;  %v3936_v26 = vld [vmem:[#allocation4 + $0xc4] ss:$16 sps:$4 sm:$0xff]   ;;  %v3938_v27 = vld [vmem:[#allocation4 + $0xcc] ss:$16 sps:$4 sm:$0xff]   ;;  %v3940_v28 = vld [vmem:[#allocation4 + $0xc0] ss:$16 sps:$4 sm:$0xff]  }
  0x54   : > { %s3506_s29 = sshll.u32 %s4547_s28, 8  ;;  %v3941_v29 = vld [vmem:[#allocation4 + $0xc8] ss:$16 sps:$4 sm:$0xff]   ;;  %v3942_v30 = vld [vmem:[#allocation4 + $0xe4] ss:$16 sps:$4 sm:$0xff]   ;;  %s3571_s5 = sshll.u32 (!%p3427_p5), %s4543_s25, 8 }
  0x55   : > { %s4321_s30 = scalar_lea.vmem [#allocation2], %s3506_s29  ;;  %v3944_v31 = vld [vmem:[#allocation4 + $0xec] ss:$16 sps:$4 sm:$0xff]   ;;  %v3946_v32 = vld [vmem:[#allocation4 + $0xe0] ss:$16 sps:$4 sm:$0xff]   ;;  %s4387_s6 = scalar_lea.vmem (!%p3427_p5), [#allocation2], %s3571_s5 }
  0x56   : > { %v3868_v36 = vld [vmem:[%s4321_s30 + $0x38] sm:$0xff]   ;;  %v3870_v38 = vld [vmem:[%s4321_s30 + $0x30] sm:$0xff]   ;;  %v3872_v40 = vld [vmem:[%s4321_s30 + $0x28] sm:$0xff]  }
  0x57   : > { %v3869_v37 = vld [vmem:[%s4321_s30 + $0xb8] sm:$0xff]   ;;  %1490 = vmatpush1.bf16.msra.mxu0 %v3868_v36  ;;  %v3871_v39 = vld [vmem:[%s4321_s30 + $0xb0] sm:$0xff]   ;;  %v3873_v41 = vld [vmem:[%s4321_s30 + $0xa8] sm:$0xff]  }
  0x58   : > { %1779 = vmatpush1.bf16.msra.mxu1 %v3869_v37  ;;  %1491 = vmatprep.subr.bf16.mxu0 %v4211_v33  ;;  %v3874_v42 = vld [vmem:[%s4321_s30 + $0x20] sm:$0xff]   ;;  %v3876_v44 = vld [vmem:[%s4321_s30 + $0x18] sm:$0xff]   ;;  %v3878_v46 = vld [vmem:[%s4321_s30 + $0x10] sm:$0xff]  }
  0x59   : > { %1780 = vmatprep.subr.bf16.mxu1 %v4211_v33  ;;  %v3875_v43 = vld [vmem:[%s4321_s30 + $0xa0] sm:$0xff]   ;;  %v3877_v45 = vld [vmem:[%s4321_s30 + $0x98] sm:$0xff]   ;;  %v3879_v47 = vld [vmem:[%s4321_s30 + $0x90] sm:$0xff]  }
  0x5a   : > { %v3880_v48 = vld [vmem:[%s4321_s30 + $0x8] sm:$0xff]   ;;  %v3882_v50 = vld [vmem:[%s4321_s30] sm:$0xff]   ;;  %v3884_v52 = vld [vmem:[%s4321_s30 + $0x78] sm:$0xff]  }
  0x5b   : > { %1492 = vmatpush1.bf16.msra.mxu0 %v3870_v38  ;;  %v3881_v49 = vld [vmem:[%s4321_s30 + $0x88] sm:$0xff]   ;;  %v3883_v51 = vld [vmem:[%s4321_s30 + $0x80] sm:$0xff]   ;;  %v3885_v53 = vld [vmem:[%s4321_s30 + $0xf8] sm:$0xff]  }
  0x5c   : > { %1781 = vmatpush1.bf16.msra.mxu1 %v3871_v39  ;;  %1493 = vmatprep.subr.bf16.mxu0 %v4211_v33  ;;  %v3886_v54 = vld [vmem:[%s4321_s30 + $0x70] sm:$0xff]   ;;  %v3888_v56 = vld [vmem:[%s4321_s30 + $0x68] sm:$0xff]   ;;  %v3890_v58 = vld [vmem:[%s4321_s30 + $0x60] sm:$0xff]  }
  0x5d   : > { %1782 = vmatprep.subr.bf16.mxu1 %v4211_v33  ;;  %v3887_v55 = vld [vmem:[%s4321_s30 + $0xf0] sm:$0xff]   ;;  %v3889_v57 = vld [vmem:[%s4321_s30 + $0xe8] sm:$0xff]   ;;  %v3891_v59 = vld [vmem:[%s4321_s30 + $0xe0] sm:$0xff]  }
  0x5e   : > { %v3892_v60 = vld [vmem:[%s4321_s30 + $0x58] sm:$0xff]   ;;  %v3894_v62 = vld [vmem:[%s4321_s30 + $0x50] sm:$0xff]   ;;  %v3896_v0 = vld [vmem:[%s4321_s30 + $0x48] sm:$0xff]  }
  0x5f   : > { %1494 = vmatpush1.bf16.msra.mxu0 %v3872_v40  ;;  %v3893_v61 = vld [vmem:[%s4321_s30 + $0xd8] sm:$0xff]   ;;  %v3895_v63 = vld [vmem:[%s4321_s30 + $0xd0] sm:$0xff]   ;;  %v3897_v1 = vld [vmem:[%s4321_s30 + $0xc8] sm:$0xff]  }
  0x60   : > { %1783 = vmatpush1.bf16.msra.mxu1 %v3873_v41  ;;  %1495 = vmatprep.subr.bf16.mxu0 %v4211_v33  ;;  %v3898_v2 = vld [vmem:[%s4321_s30 + $0x40] sm:$0xff]   ;;  %v3950_v35 = vld [vmem:[#allocation4 + $0x10c] ss:$16 sps:$4 sm:$0xff]   ;;  %v3953_v37 = vld [vmem:[#allocation4 + $0x108] ss:$16 sps:$4 sm:$0xff]  }
  0x61   : > { %1784 = vmatprep.subr.bf16.mxu1 %v4211_v33  ;;  %v3899_v3 = vld [vmem:[%s4321_s30 + $0xc0] sm:$0xff]   ;;  %v3956_v39 = vld [vmem:[#allocation4 + $0x12c] ss:$16 sps:$4 sm:$0xff]   ;;  %v3959_v41 = vld [vmem:[#allocation4 + $0x128] ss:$16 sps:$4 sm:$0xff]  }
  0x62   : > { %v3948_v34 = vld [vmem:[#allocation4 + $0x104] ss:$16 sps:$4 sm:$0xff]   ;;  %v3952_v36 = vld [vmem:[#allocation4 + $0x100] ss:$16 sps:$4 sm:$0xff]  }
  0x63   : > { %1496 = vmatpush1.bf16.msra.mxu0 %v3874_v42  ;;  %v3954_v38 = vld [vmem:[#allocation4 + $0x124] ss:$16 sps:$4 sm:$0xff]   ;;  %v3958_v40 = vld [vmem:[#allocation4 + $0x120] ss:$16 sps:$4 sm:$0xff]  }
  0x64   : > { %1785 = vmatpush1.bf16.msra.mxu1 %v3875_v43  ;;  %1497 = vmatprep.subr.bf16.mxu0 %v4211_v33  ;;  %v3960_v42 = vld [vmem:[#allocation4 + $0x144] ss:$16 sps:$4 sm:$0xff]   ;;  %v3962_v43 = vld [vmem:[#allocation4 + $0x14c] ss:$16 sps:$4 sm:$0xff]  }
  0x65   : > { %1786 = vmatprep.subr.bf16.mxu1 %v4211_v33 }
  0x67   : > { %1498 = vmatpush1.bf16.msra.mxu0 %v3876_v44  ;;  %v3964_v44 = vld [vmem:[#allocation4 + $0x140] ss:$16 sps:$4 sm:$0xff]  }
  0x68   : > { %1787 = vmatpush1.bf16.msra.mxu1 %v3877_v45  ;;  %1499 = vmatprep.subr.bf16.mxu0 %v4211_v33  ;;  %v3965_v45 = vld [vmem:[#allocation4 + $0x148] ss:$16 sps:$4 sm:$0xff]  }
  0x69   : > { %1788 = vmatprep.subr.bf16.mxu1 %v4211_v33 }
  0x6b   : > { %1500 = vmatpush1.bf16.msra.mxu0 %v3878_v46  ;;  %v3966_v46 = vld [vmem:[#allocation4 + $0x164] ss:$16 sps:$4 sm:$0xff]  }
  0x6c   : > { %1789 = vmatpush1.bf16.msra.mxu1 %v3879_v47  ;;  %1501 = vmatprep.subr.bf16.mxu0 %v4211_v33  ;;  %v3968_v47 = vld [vmem:[#allocation4 + $0x16c] ss:$16 sps:$4 sm:$0xff]  }
  0x6d   : > { %1790 = vmatprep.subr.bf16.mxu1 %v4211_v33 }
  0x6f   : > { %1502 = vmatpush1.bf16.msra.mxu0 %v3880_v48  ;;  %v3970_v48 = vld [vmem:[#allocation4 + $0x160] ss:$16 sps:$4 sm:$0xff]  }
  0x70   : > { %1791 = vmatpush1.bf16.msra.mxu1 %v3881_v49  ;;  %1503 = vmatprep.subr.bf16.mxu0 %v4211_v33  ;;  %v3971_v49 = vld [vmem:[#allocation4 + $0x168] ss:$16 sps:$4 sm:$0xff]  }
  0x71   : > { %1792 = vmatprep.subr.bf16.mxu1 %v4211_v33 }
  0x73   : > { %1504 = vmatpush1.bf16.msra.mxu0 %v3882_v50  ;;  %v3972_v50 = vld [vmem:[#allocation4 + $0x184] ss:$16 sps:$4 sm:$0xff]  }
  0x74   : > { %1793 = vmatpush1.bf16.msra.mxu1 %v3883_v51  ;;  %1505 = vmatprep.subr.bf16.mxu0 %v4211_v33  ;;  %v3974_v51 = vld [vmem:[#allocation4 + $0x18c] ss:$16 sps:$4 sm:$0xff]  }
  0x75   : > { %1794 = vmatprep.subr.bf16.mxu1 %v4211_v33 }
  0x77   : > { %1506 = vmatpush2.bf16.msra.mxu0 %v3884_v52  ;;  %v3976_v52 = vld [vmem:[#allocation4 + $0x180] ss:$16 sps:$4 sm:$0xff]  }
  0x78   : > { %1795 = vmatpush2.bf16.msra.mxu1 %v3885_v53  ;;  %1507 = vmatprep.subr.bf16.mxu0 %v4211_v33  ;;  %v3977_v53 = vld [vmem:[#allocation4 + $0x188] ss:$16 sps:$4 sm:$0xff]  }
  0x79   : > { %1796 = vmatprep.subr.bf16.mxu1 %v4211_v33 }
  0x7b   : > { %1508 = vmatpush2.bf16.msra.mxu0 %v3886_v54  ;;  %v3978_v54 = vld [vmem:[#allocation4 + $0x1a4] ss:$16 sps:$4 sm:$0xff]  }
  0x7c   : > { %1797 = vmatpush2.bf16.msra.mxu1 %v3887_v55  ;;  %1509 = vmatprep.subr.bf16.mxu0 %v4211_v33  ;;  %v3980_v55 = vld [vmem:[#allocation4 + $0x1ac] ss:$16 sps:$4 sm:$0xff]  }
  0x7d   : > { %1798 = vmatprep.subr.bf16.mxu1 %v4211_v33 }
  0x7f   : > { %1510 = vmatpush2.bf16.msra.mxu0 %v3888_v56  ;;  %v3982_v56 = vld [vmem:[#allocation4 + $0x1a0] ss:$16 sps:$4 sm:$0xff]  }
  0x80   : > { %1799 = vmatpush2.bf16.msra.mxu1 %v3889_v57  ;;  %1511 = vmatprep.subr.bf16.mxu0 %v4211_v33  ;;  %v3983_v57 = vld [vmem:[#allocation4 + $0x1a8] ss:$16 sps:$4 sm:$0xff]  }
  0x81   : > { %1800 = vmatprep.subr.bf16.mxu1 %v4211_v33 }
  0x83   : > { %1512 = vmatpush2.bf16.msra.mxu0 %v3890_v58  ;;  %v3984_v58 = vld [vmem:[#allocation4 + $0x1c4] ss:$16 sps:$4 sm:$0xff]  }
  0x84   : > { %1801 = vmatpush2.bf16.msra.mxu1 %v3891_v59  ;;  %1513 = vmatprep.subr.bf16.mxu0 %v4211_v33  ;;  %v3986_v59 = vld [vmem:[#allocation4 + $0x1cc] ss:$16 sps:$4 sm:$0xff]  }
  0x85   : > { %1802 = vmatprep.subr.bf16.mxu1 %v4211_v33 }
  0x87   : > { %1514 = vmatpush2.bf16.msra.mxu0 %v3892_v60  ;;  %v3988_v60 = vld [vmem:[#allocation4 + $0x1c0] ss:$16 sps:$4 sm:$0xff]  }
  0x88   : > { %1803 = vmatpush2.bf16.msra.mxu1 %v3893_v61  ;;  %1515 = vmatprep.subr.bf16.mxu0 %v4211_v33  ;;  %v3989_v61 = vld [vmem:[#allocation4 + $0x1c8] ss:$16 sps:$4 sm:$0xff]  }
  0x89   : > { %1804 = vmatprep.subr.bf16.mxu1 %v4211_v33 }
  0x8b   : > { %1516 = vmatpush2.bf16.msra.mxu0 %v3894_v62  ;;  %v3990_v62 = vld [vmem:[#allocation4 + $0x1e4] ss:$16 sps:$4 sm:$0xff]  }
  0x8c   : > { %1805 = vmatpush2.bf16.msra.mxu1 %v3895_v63  ;;  %1517 = vmatprep.subr.bf16.mxu0 %v4211_v33  ;;  %v3992_v63 = vld [vmem:[#allocation4 + $0x1ec] ss:$16 sps:$4 sm:$0xff]  }
  0x8d   : > { %1806 = vmatprep.subr.bf16.mxu1 %v4211_v33 }
  0x8f   : > { %1518 = vmatpush2.bf16.msra.mxu0 %v3896_v0  ;;  %v3994_v0 = vld [vmem:[#allocation4 + $0x1e0] ss:$16 sps:$4 sm:$0xff]  }
  0x90   : > { %1807 = vmatpush2.bf16.msra.mxu1 %v3897_v1  ;;  %1519 = vmatprep.subr.bf16.mxu0 %v4211_v33  ;;  %v3995_v1 = vld [vmem:[#allocation4 + $0x1e8] ss:$16 sps:$4 sm:$0xff]  }
  0x91   : > { %1808 = vmatprep.subr.bf16.mxu1 %v4211_v33  ;;  %v3947_v33 = vld [vmem:[#allocation4 + $0xe8] ss:$16 sps:$4 sm:$0xff]  }
  0x93   : > { %1520 = vmatpush2.bf16.msra.mxu0 %v3898_v2  ;;  %v3996_v2 = vld [vmem:[#allocation4 + $0x204] ss:$16 sps:$4 sm:$0xff]  }
  0x94   : > { %1809 = vmatpush2.bf16.msra.mxu1 %v3899_v3  ;;  %v3998_v3 = vld [vmem:[#allocation4 + $0x20c] ss:$16 sps:$4 sm:$0xff]  }
  0x96   : > { %1522 = vmatmul.mubr.bf16.vlgmr.msra.gmra.mxu0 %v3900_v4  ;;  %v4000_v4 = vld [vmem:[#allocation4 + $0x200] ss:$16 sps:$4 sm:$0xff]  }
  0x97   : > { %1811 = vmatmul.mubr.bf16.vlgmr.msra.gmra.mxu1 %v3903_v5  ;;  %1529 = vmatprep.mubr.bf16.mxu0 %v3906_v6  ;;  %v4001_v5 = vld [vmem:[#allocation4 + $0x208] ss:$16 sps:$4 sm:$0xff]   ;;  %v4002_v6 = vld [vmem:[#allocation4 + $0x224] ss:$16 sps:$4 sm:$0xff]  }
  0x98   : > { %1818 = vmatprep.mubr.bf16.mxu1 %v3908_v7  ;;  %v4004_v7 = vld [vmem:[#allocation4 + $0x22c] ss:$16 sps:$4 sm:$0xff]  }
  0x9e   : > { %1530 = vmatmul.mubr.bf16.gmra.mxu0 %v3910_v8  ;;  %v4006_v8 = vld [vmem:[#allocation4 + $0x220] ss:$16 sps:$4 sm:$0xff]  }
  0x9f   : > { %1819 = vmatmul.mubr.bf16.gmra.mxu1 %v3911_v9  ;;  %1537 = vmatprep.mubr.bf16.mxu0 %v3912_v10  ;;  %v4007_v9 = vld [vmem:[#allocation4 + $0x228] ss:$16 sps:$4 sm:$0xff]   ;;  %v4008_v10 = vld [vmem:[#allocation4 + $0x244] ss:$16 sps:$4 sm:$0xff]  }
  0xa0   : > { %1826 = vmatprep.mubr.bf16.mxu1 %v3914_v11  ;;  %v4010_v11 = vld [vmem:[#allocation4 + $0x24c] ss:$16 sps:$4 sm:$0xff]  }
  0xa6   : > { %1538 = vmatmul.mubr.bf16.gmra.mxu0 %v3916_v12  ;;  %v4012_v12 = vld [vmem:[#allocation4 + $0x240] ss:$16 sps:$4 sm:$0xff]  }
  0xa7   : > { %1827 = vmatmul.mubr.bf16.gmra.mxu1 %v3917_v13  ;;  %1545 = vmatprep.mubr.bf16.mxu0 %v3918_v14  ;;  %v4013_v13 = vld [vmem:[#allocation4 + $0x248] ss:$16 sps:$4 sm:$0xff]   ;;  %v4014_v14 = vld [vmem:[#allocation4 + $0x264] ss:$16 sps:$4 sm:$0xff]  }
  0xa8   : > { %1834 = vmatprep.mubr.bf16.mxu1 %v3920_v15  ;;  %v4016_v15 = vld [vmem:[#allocation4 + $0x26c] ss:$16 sps:$4 sm:$0xff]  }
  0xae   : > { %1546 = vmatmul.mubr.bf16.gmra.mxu0 %v3922_v16  ;;  %v4018_v16 = vld [vmem:[#allocation4 + $0x260] ss:$16 sps:$4 sm:$0xff]  }
  0xaf   : > { %1835 = vmatmul.mubr.bf16.gmra.mxu1 %v3923_v17  ;;  %1553 = vmatprep.mubr.bf16.mxu0 %v3924_v18  ;;  %v4019_v17 = vld [vmem:[#allocation4 + $0x268] ss:$16 sps:$4 sm:$0xff]   ;;  %v4020_v18 = vld [vmem:[#allocation4 + $0x284] ss:$16 sps:$4 sm:$0xff]  }
  0xb0   : > { %1842 = vmatprep.mubr.bf16.mxu1 %v3926_v19  ;;  %v4022_v19 = vld [vmem:[#allocation4 + $0x28c] ss:$16 sps:$4 sm:$0xff]  }
  0xb6   : > { %1554 = vmatmul.mubr.bf16.gmra.mxu0 %v3928_v20  ;;  %v4024_v20 = vld [vmem:[#allocation4 + $0x280] ss:$16 sps:$4 sm:$0xff]  }
  0xb7   : > { %1843 = vmatmul.mubr.bf16.gmra.mxu1 %v3929_v21  ;;  %1561 = vmatprep.mubr.bf16.mxu0 %v3930_v22  ;;  %v4025_v21 = vld [vmem:[#allocation4 + $0x288] ss:$16 sps:$4 sm:$0xff]   ;;  %v4026_v22 = vld [vmem:[#allocation4 + $0x2a4] ss:$16 sps:$4 sm:$0xff]  }
  0xb8   : > { %1850 = vmatprep.mubr.bf16.mxu1 %v3932_v23  ;;  %v4028_v23 = vld [vmem:[#allocation4 + $0x2ac] ss:$16 sps:$4 sm:$0xff]  }
  0xbe   : > { %1562 = vmatmul.mubr.bf16.gmra.mxu0 %v3934_v24  ;;  %v4030_v24 = vld [vmem:[#allocation4 + $0x2a0] ss:$16 sps:$4 sm:$0xff]  }
  0xbf   : > { %1851 = vmatmul.mubr.bf16.gmra.mxu1 %v3935_v25  ;;  %1569 = vmatprep.mubr.bf16.mxu0 %v3936_v26  ;;  %v4031_v25 = vld [vmem:[#allocation4 + $0x2a8] ss:$16 sps:$4 sm:$0xff]   ;;  %v4032_v26 = vld [vmem:[#allocation4 + $0x2c4] ss:$16 sps:$4 sm:$0xff]  }
  0xc0   : > { %1858 = vmatprep.mubr.bf16.mxu1 %v3938_v27  ;;  %v4034_v27 = vld [vmem:[#allocation4 + $0x2cc] ss:$16 sps:$4 sm:$0xff]  }
  0xc6   : > { %1570 = vmatmul.mubr.bf16.gmra.mxu0 %v3940_v28  ;;  %v4036_v28 = vld [vmem:[#allocation4 + $0x2c0] ss:$16 sps:$4 sm:$0xff]  }
  0xc7   : > { %1859 = vmatmul.mubr.bf16.gmra.mxu1 %v3941_v29  ;;  %1577 = vmatprep.mubr.bf16.mxu0 %v3942_v30  ;;  %v4037_v29 = vld [vmem:[#allocation4 + $0x2c8] ss:$16 sps:$4 sm:$0xff]   ;;  %v4038_v30 = vld [vmem:[#allocation4 + $0x2e4] ss:$16 sps:$4 sm:$0xff]  }
  0xc8   : > { %1866 = vmatprep.mubr.bf16.mxu1 %v3944_v31  ;;  %v4040_v31 = vld [vmem:[#allocation4 + $0x2ec] ss:$16 sps:$4 sm:$0xff]  }
  0xce   : > { %1578 = vmatmul.mubr.bf16.gmra.mxu0 %v3946_v32  ;;  %v4042_v32 = vld [vmem:[#allocation4 + $0x2e0] ss:$16 sps:$4 sm:$0xff]  }
  0xcf   : > { %1867 = vmatmul.mubr.bf16.gmra.mxu1 %v3947_v33  ;;  %1585 = vmatprep.mubr.bf16.mxu0 %v3948_v34  ;;  %v4043_v33 = vld [vmem:[#allocation4 + $0x2e8] ss:$16 sps:$4 sm:$0xff]   ;;  %v4044_v34 = vld [vmem:[#allocation4 + $0x304] ss:$16 sps:$4 sm:$0xff]  }
  0xd0   : > { %1874 = vmatprep.mubr.bf16.mxu1 %v3950_v35  ;;  %v4046_v35 = vld [vmem:[#allocation4 + $0x30c] ss:$16 sps:$4 sm:$0xff]  }
  0xd6   : > { %1586 = vmatmul.mubr.bf16.gmra.mxu0 %v3952_v36  ;;  %v4048_v36 = vld [vmem:[#allocation4 + $0x300] ss:$16 sps:$4 sm:$0xff]  }
  0xd7   : > { %1875 = vmatmul.mubr.bf16.gmra.mxu1 %v3953_v37  ;;  %1593 = vmatprep.mubr.bf16.mxu0 %v3954_v38  ;;  %v4049_v37 = vld [vmem:[#allocation4 + $0x308] ss:$16 sps:$4 sm:$0xff]   ;;  %v4050_v38 = vld [vmem:[#allocation4 + $0x324] ss:$16 sps:$4 sm:$0xff]  }
  0xd8   : > { %1882 = vmatprep.mubr.bf16.mxu1 %v3956_v39  ;;  %v4052_v39 = vld [vmem:[#allocation4 + $0x32c] ss:$16 sps:$4 sm:$0xff]  }
  0xde   : > { %1594 = vmatmul.mubr.bf16.gmra.mxu0 %v3958_v40 }
  0xdf   : > { %1883 = vmatmul.mubr.bf16.gmra.mxu1 %v3959_v41  ;;  %1601 = vmatprep.mubr.bf16.mxu0 %v3960_v42 }
  0xe0   : > { %1890 = vmatprep.mubr.bf16.mxu1 %v3962_v43 }
  0xe6   : > { %1602 = vmatmul.mubr.bf16.gmra.mxu0 %v3964_v44 }
  0xe7   : > { %1891 = vmatmul.mubr.bf16.gmra.mxu1 %v3965_v45  ;;  %1609 = vmatprep.mubr.bf16.mxu0 %v3966_v46  ;;  %v4054_v46 = vld [vmem:[#allocation4 + $0x320] ss:$16 sps:$4 sm:$0xff]  }
  0xe8   : > { %1898 = vmatprep.mubr.bf16.mxu1 %v3968_v47 }
  0xee   : > { %1610 = vmatmul.mubr.bf16.gmra.mxu0 %v3970_v48  ;;  %v4055_v48 = vld [vmem:[#allocation4 + $0x328] ss:$16 sps:$4 sm:$0xff]  }
  0xef   : > { %1899 = vmatmul.mubr.bf16.gmra.mxu1 %v3971_v49  ;;  %1617 = vmatprep.mubr.bf16.mxu0 %v3972_v50  ;;  %v4056_v49 = vld [vmem:[#allocation4 + $0x344] ss:$16 sps:$4 sm:$0xff]  }
  0xf0   : > { %1906 = vmatprep.mubr.bf16.mxu1 %v3974_v51 }
  0xf6   : > { %1618 = vmatmul.mubr.bf16.gmra.mxu0 %v3976_v52  ;;  %v4058_v52 = vld [vmem:[#allocation4 + $0x34c] ss:$16 sps:$4 sm:$0xff]  }
  0xf7   : > { %1907 = vmatmul.mubr.bf16.gmra.mxu1 %v3977_v53  ;;  %1625 = vmatprep.mubr.bf16.mxu0 %v3978_v54 }
  0xf8   : > { %1914 = vmatprep.mubr.bf16.mxu1 %v3980_v55 }
  0xfe   : > { %1626 = vmatmul.mubr.bf16.gmra.mxu0 %v3982_v56 }
  0xff   : > { %1915 = vmatmul.mubr.bf16.gmra.mxu1 %v3983_v57  ;;  %1633 = vmatprep.mubr.bf16.mxu0 %v3984_v58 }
 0x100   : > { %1922 = vmatprep.mubr.bf16.mxu1 %v3986_v59 }
 0x106   : > { %1634 = vmatmul.mubr.bf16.gmra.mxu0 %v3988_v60  ;;  %v4060_v60 = vld [vmem:[#allocation4 + $0x340] ss:$16 sps:$4 sm:$0xff]  }
 0x107   : > { %1923 = vmatmul.mubr.bf16.gmra.mxu1 %v3989_v61  ;;  %1641 = vmatprep.mubr.bf16.mxu0 %v3990_v62  ;;  %v4061_v62 = vld [vmem:[#allocation4 + $0x348] ss:$16 sps:$4 sm:$0xff]  }
 0x108   : > { %1930 = vmatprep.mubr.bf16.mxu1 %v3992_v63  ;;  %v4062_v63 = vld [vmem:[#allocation4 + $0x364] ss:$16 sps:$4 sm:$0xff]  }
 0x10e   : > { %1642 = vmatmul.mubr.bf16.gmra.mxu0 %v3994_v0 }
 0x10f   : > { %1931 = vmatmul.mubr.bf16.gmra.mxu1 %v3995_v1  ;;  %1649 = vmatprep.mubr.bf16.mxu0 %v3996_v2  ;;  %v4064_v2 = vld [vmem:[#allocation4 + $0x36c] ss:$16 sps:$4 sm:$0xff]  }
 0x110   : > { %1938 = vmatprep.mubr.bf16.mxu1 %v3998_v3 }
 0x116   : > { %1650 = vmatmul.mubr.bf16.gmra.mxu0 %v4000_v4 }
 0x117   : > { %1939 = vmatmul.mubr.bf16.gmra.mxu1 %v4001_v5  ;;  %1657 = vmatprep.mubr.bf16.mxu0 %v4002_v6 }
 0x118   : > { %1946 = vmatprep.mubr.bf16.mxu1 %v4004_v7 }
 0x11e   : > { %1658 = vmatmul.mubr.bf16.gmra.mxu0 %v4006_v8 }
 0x11f   : > { %1947 = vmatmul.mubr.bf16.gmra.mxu1 %v4007_v9  ;;  %1665 = vmatprep.mubr.bf16.mxu0 %v4008_v10  ;;  %v4066_v10 = vld [vmem:[#allocation4 + $0x360] ss:$16 sps:$4 sm:$0xff]  }
 0x120   : > { %1954 = vmatprep.mubr.bf16.mxu1 %v4010_v11 }
 0x126   : > { %1666 = vmatmul.mubr.bf16.gmra.mxu0 %v4012_v12  ;;  %v4067_v12 = vld [vmem:[#allocation4 + $0x368] ss:$16 sps:$4 sm:$0xff]  }
 0x127   : > { %1955 = vmatmul.mubr.bf16.gmra.mxu1 %v4013_v13  ;;  %1673 = vmatprep.mubr.bf16.mxu0 %v4014_v14  ;;  %v4070_v13 = vld [vmem:[#allocation4 + $0x384] ss:$16 sps:$4 sm:$0xff]  }
 0x128   : > { %1962 = vmatprep.mubr.bf16.mxu1 %v4016_v15 }
 0x12e   : > { %1674 = vmatmul.mubr.bf16.gmra.mxu0 %v4018_v16  ;;  %v4073_v16 = vld [vmem:[#allocation4 + $0x38c] ss:$16 sps:$4 sm:$0xff]  }
 0x12f   : > { %1963 = vmatmul.mubr.bf16.gmra.mxu1 %v4019_v17  ;;  %1681 = vmatprep.mubr.bf16.mxu0 %v4020_v18 }
 0x130   : > { %1970 = vmatprep.mubr.bf16.mxu1 %v4022_v19 }
 0x136   : > { %1682 = vmatmul.mubr.bf16.gmra.mxu0 %v4024_v20 }
 0x137   : > { %1971 = vmatmul.mubr.bf16.gmra.mxu1 %v4025_v21  ;;  %1689 = vmatprep.mubr.bf16.mxu0 %v4026_v22 }
 0x138   : > { %1978 = vmatprep.mubr.bf16.mxu1 %v4028_v23 }
 0x13e   : > { %1690 = vmatmul.mubr.bf16.gmra.mxu0 %v4030_v24  ;;  %v4068_v24 = vld [vmem:[#allocation4 + $0x380] ss:$16 sps:$4 sm:$0xff]  }
 0x13f   : > { %1979 = vmatmul.mubr.bf16.gmra.mxu1 %v4031_v25  ;;  %1697 = vmatprep.mubr.bf16.mxu0 %v4032_v26  ;;  %v4071_v26 = vld [vmem:[#allocation4 + $0x388] ss:$16 sps:$4 sm:$0xff]  }
 0x140   : > { %1986 = vmatprep.mubr.bf16.mxu1 %v4034_v27  ;;  %v4076_v27 = vld [vmem:[#allocation4 + $0x3a4] ss:$16 sps:$4 sm:$0xff]  }
 0x146   : > { %1698 = vmatmul.mubr.bf16.gmra.mxu0 %v4036_v28 }
 0x147   : > { %1987 = vmatmul.mubr.bf16.gmra.mxu1 %v4037_v29  ;;  %1705 = vmatprep.mubr.bf16.mxu0 %v4038_v30  ;;  %v4079_v30 = vld [vmem:[#allocation4 + $0x3ac] ss:$16 sps:$4 sm:$0xff]  }
 0x148   : > { %1994 = vmatprep.mubr.bf16.mxu1 %v4040_v31 }
 0x14e   : > { %1706 = vmatmul.mubr.bf16.gmra.mxu0 %v4042_v32 }
 0x14f   : > { %1995 = vmatmul.mubr.bf16.gmra.mxu1 %v4043_v33  ;;  %1713 = vmatprep.mubr.bf16.mxu0 %v4044_v34 }
 0x150   : > { %2002 = vmatprep.mubr.bf16.mxu1 %v4046_v35 }
 0x156   : > { %v1523_v40 = vpop.f32.mrf.mxu0  ;;  %1714 = vmatmul.mubr.bf16.gmra.mxu0 %v4048_v36 }
 0x157   : > { %v1812_v41 = vpop.f32.mrf.mxu1  ;;  %2003 = vmatmul.mubr.bf16.gmra.mxu1 %v4049_v37  ;;  %1721 = vmatprep.mubr.bf16.mxu0 %v4050_v38  ;;  %v4074_v38 = vld [vmem:[#allocation4 + $0x3a0] ss:$16 sps:$4 sm:$0xff]  }
 0x158   : > { %v1813_v42 = vadd.f32 %v1812_v41, %v1523_v40  ;;  %v1525_v43 = vpop.f32.mrf.mxu0  ;;  %2010 = vmatprep.mubr.bf16.mxu1 %v4052_v39  ;;  %v4077_v40 = vld [vmem:[#allocation4 + $0x3a8] ss:$16 sps:$4 sm:$0xff]   ;;  %v4082_v41 = vld [vmem:[#allocation4 + $0x3c4] ss:$16 sps:$4 sm:$0xff]  }
 0x159   : > { %v1814_v44 = vpop.f32.mrf.mxu1 }
 0x15a   : > { %2070 = vst [vmem:[#allocation3 + $0xb0] sm:$0xff] %v1813_v42  ;;  %v1526_v45 = vpop.f32.mrf.mxu0  ;;  %v4085_v44 = vld [vmem:[#allocation4 + $0x3cc] ss:$16 sps:$4 sm:$0xff]  }
 0x15b   : > { %v1815_v47 = vpop.f32.mrf.mxu1 }
 0x15c   : > { %v1816_v50 = vadd.f32 %v1815_v47, %v1526_v45  ;;  %v1528_v51 = vpop.f32.mrf.mxu0 }
 0x15d   : > { %v1817_v53 = vpop.f32.mrf.mxu1 }
 0x15e   : > { %2071 = vst [vmem:[#allocation3 + $0x1b0] sm:$0xff] %v1816_v50  ;;  %v1531_v54 = vpop.f32.mrf.mxu0  ;;  %1722 = vmatmul.mubr.bf16.gmra.mxu0 %v4054_v46 }
 0x15f   : > { %v1820_v55 = vpop.f32.mrf.mxu1  ;;  %2011 = vmatmul.mubr.bf16.gmra.mxu1 %v4055_v48  ;;  %1729 = vmatprep.mubr.bf16.mxu0 %v4056_v49 }
 0x160   : > { %v1821_v56 = vadd.f32 %v1820_v55, %v1531_v54  ;;  %v1533_v57 = vpop.f32.mrf.mxu0  ;;  %2018 = vmatprep.mubr.bf16.mxu1 %v4058_v52  ;;  %v4080_v52 = vld [vmem:[#allocation4 + $0x3c0] ss:$16 sps:$4 sm:$0xff]   ;;  %v4083_v54 = vld [vmem:[#allocation4 + $0x3c8] ss:$16 sps:$4 sm:$0xff]   ;;  %v4088_v55 = vld [vmem:[#allocation4 + $0x3e4] ss:$16 sps:$4 sm:$0xff]  }
 0x161   : > { %v1822_v58 = vpop.f32.mrf.mxu1 }
 0x162   : > { %2072 = vst [vmem:[#allocation3 + $0xd8] sm:$0xff] %v1821_v56  ;;  %v1534_v59 = vpop.f32.mrf.mxu0  ;;  %v4091_v58 = vld [vmem:[#allocation4 + $0x3ec] ss:$16 sps:$4 sm:$0xff]  }
 0x163   : > { %v1823_v61 = vpop.f32.mrf.mxu1 }
 0x164   : > { %v1824_v0 = vadd.f32 %v1823_v61, %v1534_v59  ;;  %v1536_v1 = vpop.f32.mrf.mxu0 }
 0x165   : > { %v1825_v3 = vpop.f32.mrf.mxu1 }
 0x166   : > { %2073 = vst [vmem:[#allocation3 + $0x18] sm:$0xff] %v1824_v0  ;;  %v1539_v4 = vpop.f32.mrf.mxu0  ;;  %1730 = vmatmul.mubr.bf16.gmra.mxu0 %v4060_v60 }
 0x167   : > { %v1828_v5 = vpop.f32.mrf.mxu1  ;;  %2019 = vmatmul.mubr.bf16.gmra.mxu1 %v4061_v62  ;;  %1737 = vmatprep.mubr.bf16.mxu0 %v4062_v63 }
 0x168   : > { %v1829_v6 = vadd.f32 %v1828_v5, %v1539_v4  ;;  %v1541_v7 = vpop.f32.mrf.mxu0  ;;  %2026 = vmatprep.mubr.bf16.mxu1 %v4064_v2  ;;  %v4086_v2 = vld [vmem:[#allocation4 + $0x3e0] ss:$16 sps:$4 sm:$0xff]   ;;  %v4089_v4 = vld [vmem:[#allocation4 + $0x3e8] ss:$16 sps:$4 sm:$0xff]  }
 0x169   : > { %v1830_v8 = vpop.f32.mrf.mxu1 }
 0x16a   : > { %2074 = vst [vmem:[#allocation3 + $0x50] sm:$0xff] %v1829_v6  ;;  %v1542_v9 = vpop.f32.mrf.mxu0 }
 0x16b   : > { %v1831_v11 = vpop.f32.mrf.mxu1 }
 0x16c   : > { %v1832_v14 = vadd.f32 %v1831_v11, %v1542_v9  ;;  %v1544_v15 = vpop.f32.mrf.mxu0 }
 0x16d   : > { %v1833_v17 = vpop.f32.mrf.mxu1 }
 0x16e   : > { %2075 = vst [vmem:[#allocation3 + $0x168] sm:$0xff] %v1832_v14  ;;  %v1547_v18 = vpop.f32.mrf.mxu0  ;;  %1738 = vmatmul.mubr.bf16.gmra.mxu0 %v4066_v10 }
 0x16f   : > { %v1836_v19 = vpop.f32.mrf.mxu1  ;;  %2027 = vmatmul.mubr.bf16.gmra.mxu1 %v4067_v12  ;;  %1745 = vmatprep.mubr.bf16.mxu0 %v4070_v13 }
 0x170   : > { %v1837_v20 = vadd.f32 %v1836_v19, %v1547_v18  ;;  %v1549_v21 = vpop.f32.mrf.mxu0  ;;  %2034 = vmatprep.mubr.bf16.mxu1 %v4073_v16 }
 0x171   : > { %v1838_v22 = vpop.f32.mrf.mxu1 }
 0x172   : > { %2076 = vst [vmem:[#allocation3 + $0x130] sm:$0xff] %v1837_v20  ;;  %v1550_v23 = vpop.f32.mrf.mxu0 }
 0x173   : > { %v1839_v25 = vpop.f32.mrf.mxu1 }
 0x174   : > { %v1840_v28 = vadd.f32 %v1839_v25, %v1550_v23  ;;  %v1552_v29 = vpop.f32.mrf.mxu0 }
 0x175   : > { %v1841_v31 = vpop.f32.mrf.mxu1 }
 0x176   : > { %2077 = vst [vmem:[#allocation3 + $0x48] sm:$0xff] %v1840_v28  ;;  %v1555_v32 = vpop.f32.mrf.mxu0  ;;  %1746 = vmatmul.mubr.bf16.gmra.mxu0 %v4068_v24 }
 0x177   : > { %v1844_v33 = vpop.f32.mrf.mxu1  ;;  %2035 = vmatmul.mubr.bf16.gmra.mxu1 %v4071_v26  ;;  %1753 = vmatprep.mubr.bf16.mxu0 %v4076_v27 }
 0x178   : > { %v1845_v34 = vadd.f32 %v1844_v33, %v1555_v32  ;;  %v1557_v35 = vpop.f32.mrf.mxu0  ;;  %2042 = vmatprep.mubr.bf16.mxu1 %v4079_v30 }
 0x179   : > { %v1846_v36 = vpop.f32.mrf.mxu1 }
 0x17a   : > { %2078 = vst [vmem:[#allocation3 + $0x180] sm:$0xff] %v1845_v34  ;;  %v1558_v37 = vpop.f32.mrf.mxu0 }
 0x17b   : > { %v1847_v39 = vpop.f32.mrf.mxu1 }
 0x17c   : > { %v1848_v42 = vadd.f32 %v1847_v39, %v1558_v37  ;;  %v1560_v43 = vpop.f32.mrf.mxu0 }
 0x17d   : > { %v1849_v45 = vpop.f32.mrf.mxu1 }
 0x17e   : > { %2079 = vst [vmem:[#allocation3 + $0x110] sm:$0xff] %v1848_v42  ;;  %v1563_v46 = vpop.f32.mrf.mxu0  ;;  %1754 = vmatmul.mubr.bf16.gmra.mxu0 %v4074_v38 }
 0x17f   : > { %v1852_v47 = vpop.f32.mrf.mxu1  ;;  %2043 = vmatmul.mubr.bf16.gmra.mxu1 %v4077_v40  ;;  %1761 = vmatprep.mubr.bf16.mxu0 %v4082_v41 }
 0x180   : > { %v1853_v48 = vadd.f32 %v1852_v47, %v1563_v46  ;;  %v1565_v49 = vpop.f32.mrf.mxu0  ;;  %2050 = vmatprep.mubr.bf16.mxu1 %v4085_v44 }
 0x181   : > { %v1854_v50 = vpop.f32.mrf.mxu1 }
 0x182   : > { %2080 = vst [vmem:[#allocation3 + $0x118] sm:$0xff] %v1853_v48  ;;  %v1566_v51 = vpop.f32.mrf.mxu0 }
 0x183   : > { %v1855_v53 = vpop.f32.mrf.mxu1 }
 0x184   : > { %v1856_v56 = vadd.f32 %v1855_v53, %v1566_v51  ;;  %v1568_v57 = vpop.f32.mrf.mxu0 }
 0x185   : > { %v1857_v59 = vpop.f32.mrf.mxu1 }
 0x186   : > { %2081 = vst [vmem:[#allocation3 + $0x98] sm:$0xff] %v1856_v56  ;;  %v1571_v60 = vpop.f32.mrf.mxu0  ;;  %1762 = vmatmul.mubr.bf16.gmra.mxu0 %v4080_v52 }
 0x187   : > { %v1860_v61 = vpop.f32.mrf.mxu1  ;;  %2051 = vmatmul.mubr.bf16.gmra.mxu1 %v4083_v54  ;;  %1769 = vmatprep.mubr.bf16.mxu0 %v4088_v55 }
 0x188   : > { %v1861_v62 = vadd.f32 %v1860_v61, %v1571_v60  ;;  %v1573_v63 = vpop.f32.mrf.mxu0  ;;  %2058 = vmatprep.mubr.bf16.mxu1 %v4091_v58 }
 0x189   : > { %v1862_v0 = vpop.f32.mrf.mxu1 }
 0x18a   : > { %2082 = vst [vmem:[#allocation3 + $0x120] sm:$0xff] %v1861_v62  ;;  %v1574_v1 = vpop.f32.mrf.mxu0 }
 0x18b   : > { %v1863_v3 = vpop.f32.mrf.mxu1 }
 0x18c   : > { %v1864_v5 = vadd.f32 %v1863_v3, %v1574_v1  ;;  %v1576_v6 = vpop.f32.mrf.mxu0 }
 0x18d   : > { %v1865_v7 = vpop.f32.mrf.mxu1 }
 0x18e   : > { %2083 = vst [vmem:[#allocation3 + $0x150] sm:$0xff] %v1864_v5  ;;  %v1579_v8 = vpop.f32.mrf.mxu0  ;;  %1770 = vmatmul.mubr.bf16.gmra.mxu0 %v4086_v2 }
 0x18f   : > { %v1868_v9 = vpop.f32.mrf.mxu1  ;;  %2059 = vmatmul.mubr.bf16.gmra.mxu1 %v4089_v4 }
 0x190   : > { %v1869_v10 = vadd.f32 %v1868_v9, %v1579_v8  ;;  %v1581_v11 = vpop.f32.mrf.mxu0 }
 0x191   : > { %v1870_v12 = vpop.f32.mrf.mxu1 }
 0x192   : > { %2084 = vst [vmem:[#allocation3 + $0x108] sm:$0xff] %v1869_v10  ;;  %v1582_v13 = vpop.f32.mrf.mxu0 }
 0x193   : > { %v1871_v14 = vpop.f32.mrf.mxu1 }
 0x194   : > { %v1872_v15 = vadd.f32 %v1871_v14, %v1582_v13  ;;  %v1584_v16 = vpop.f32.mrf.mxu0 }
 0x195   : > { %v1873_v17 = vpop.f32.mrf.mxu1 }
 0x196   : > { %2085 = vst [vmem:[#allocation3 + $0x60] sm:$0xff] %v1872_v15  ;;  %v1587_v18 = vpop.f32.mrf.mxu0 }
 0x197   : > { %v1876_v19 = vpop.f32.mrf.mxu1 }
 0x198   : > { %v1877_v20 = vadd.f32 %v1876_v19, %v1587_v18  ;;  %v1589_v21 = vpop.f32.mrf.mxu0 }
 0x199   : > { %v1878_v22 = vpop.f32.mrf.mxu1 }
 0x19a   : > { %2086 = vst [vmem:[#allocation3 + $0xe0] sm:$0xff] %v1877_v20  ;;  %v1590_v23 = vpop.f32.mrf.mxu0 }
 0x19b   : > { %v1879_v24 = vpop.f32.mrf.mxu1 }
 0x19c   : > { %v1880_v25 = vadd.f32 %v1879_v24, %v1590_v23  ;;  %v1592_v26 = vpop.f32.mrf.mxu0 }
 0x19d   : > { %v1881_v27 = vpop.f32.mrf.mxu1 }
 0x19e   : > { %2087 = vst [vmem:[#allocation3 + $0x188] sm:$0xff] %v1880_v25  ;;  %v1595_v28 = vpop.f32.mrf.mxu0 }
 0x19f   : > { %v1884_v29 = vpop.f32.mrf.mxu1 }
 0x1a0   : > { %v1885_v30 = vadd.f32 %v1884_v29, %v1595_v28  ;;  %v1597_v31 = vpop.f32.mrf.mxu0 }
 0x1a1   : > { %v1886_v32 = vpop.f32.mrf.mxu1 }
 0x1a2   : > { %2088 = vst [vmem:[#allocation3 + $0x138] sm:$0xff] %v1885_v30  ;;  %v1598_v33 = vpop.f32.mrf.mxu0 }
 0x1a3   : > { %v1887_v34 = vpop.f32.mrf.mxu1 }
 0x1a4   : > { %v1888_v35 = vadd.f32 %v1887_v34, %v1598_v33  ;;  %v1600_v36 = vpop.f32.mrf.mxu0 }
 0x1a5   : > { %v1889_v37 = vpop.f32.mrf.mxu1 }
 0x1a6   : > { %2089 = vst [vmem:[#allocation3 + $0x140] sm:$0xff] %v1888_v35  ;;  %v1603_v38 = vpop.f32.mrf.mxu0 }
 0x1a7   : > { %v1892_v39 = vpop.f32.mrf.mxu1 }
 0x1a8   : > { %v1893_v40 = vadd.f32 %v1892_v39, %v1603_v38  ;;  %v1605_v41 = vpop.f32.mrf.mxu0 }
 0x1a9   : > { %v1894_v42 = vpop.f32.mrf.mxu1 }
 0x1aa   : > { %2090 = vst [vmem:[#allocation3 + $0x80] sm:$0xff] %v1893_v40  ;;  %v1606_v43 = vpop.f32.mrf.mxu0 }
 0x1ab   : > { %v1895_v44 = vpop.f32.mrf.mxu1 }
 0x1ac   : > { %v1896_v45 = vadd.f32 %v1895_v44, %v1606_v43  ;;  %v1608_v46 = vpop.f32.mrf.mxu0 }
 0x1ad   : > { %v1897_v47 = vpop.f32.mrf.mxu1 }
 0x1ae   : > { %2091 = vst [vmem:[#allocation3 + $0x1a8] sm:$0xff] %v1896_v45  ;;  %v1611_v48 = vpop.f32.mrf.mxu0 }
 0x1af   : > { %v1900_v49 = vpop.f32.mrf.mxu1 }
 0x1b0   : > { %v1901_v50 = vadd.f32 %v1900_v49, %v1611_v48  ;;  %v1613_v51 = vpop.f32.mrf.mxu0 }
 0x1b1   : > { %v1902_v52 = vpop.f32.mrf.mxu1 }
 0x1b2   : > { %2092 = vst [vmem:[#allocation3 + $0x1b8] sm:$0xff] %v1901_v50  ;;  %v1614_v53 = vpop.f32.mrf.mxu0 }
 0x1b3   : > { %v1903_v54 = vpop.f32.mrf.mxu1 }
 0x1b4   : > { %v1904_v55 = vadd.f32 %v1903_v54, %v1614_v53  ;;  %v1616_v56 = vpop.f32.mrf.mxu0 }
 0x1b5   : > { %v1905_v57 = vpop.f32.mrf.mxu1 }
 0x1b6   : > { %2093 = vst [vmem:[#allocation3 + $0x28] sm:$0xff] %v1904_v55  ;;  %v1619_v58 = vpop.f32.mrf.mxu0 }
 0x1b7   : > { %v1908_v59 = vpop.f32.mrf.mxu1 }
 0x1b8   : > { %v1909_v60 = vadd.f32 %v1908_v59, %v1619_v58  ;;  %v1621_v61 = vpop.f32.mrf.mxu0 }
 0x1b9   : > { %v1910_v62 = vpop.f32.mrf.mxu1 }
 0x1ba   : > { %2094 = vst [vmem:[#allocation3 + $0x1e8] sm:$0xff] %v1909_v60  ;;  %v1622_v63 = vpop.f32.mrf.mxu0 }
 0x1bb   : > { %v1911_v0 = vpop.f32.mrf.mxu1 }
 0x1bc   : > { %v1912_v1 = vadd.f32 %v1911_v0, %v1622_v63  ;;  %v1624_v2 = vpop.f32.mrf.mxu0 }
 0x1bd   : > { %v1913_v3 = vpop.f32.mrf.mxu1 }
 0x1be   : > { %2095 = vst [vmem:[#allocation3 + $0xf8] sm:$0xff] %v1912_v1  ;;  %v1627_v4 = vpop.f32.mrf.mxu0 }
 0x1bf   : > { %v1916_v5 = vpop.f32.mrf.mxu1 }
 0x1c0   : > { %v1917_v6 = vadd.f32 %v1916_v5, %v1627_v4  ;;  %v1629_v7 = vpop.f32.mrf.mxu0 }
 0x1c1   : > { %v1918_v8 = vpop.f32.mrf.mxu1 }
 0x1c2   : > { %2096 = vst [vmem:[#allocation3 + $0x160] sm:$0xff] %v1917_v6  ;;  %v1630_v9 = vpop.f32.mrf.mxu0 }
 0x1c3   : > { %v1919_v10 = vpop.f32.mrf.mxu1 }
 0x1c4   : > { %v1920_v11 = vadd.f32 %v1919_v10, %v1630_v9  ;;  %v1632_v12 = vpop.f32.mrf.mxu0 }
 0x1c5   : > { %v1921_v13 = vpop.f32.mrf.mxu1 }
 0x1c6   : > { %2097 = vst [vmem:[#allocation3 + $0x30] sm:$0xff] %v1920_v11  ;;  %v1635_v14 = vpop.f32.mrf.mxu0 }
 0x1c7   : > { %v1924_v15 = vpop.f32.mrf.mxu1 }
 0x1c8   : > { %v1925_v16 = vadd.f32 %v1924_v15, %v1635_v14  ;;  %v1637_v17 = vpop.f32.mrf.mxu0 }
 0x1c9   : > { %v1926_v18 = vpop.f32.mrf.mxu1 }
 0x1ca   : > { %2098 = vst [vmem:[#allocation3 + $0x1e0] sm:$0xff] %v1925_v16  ;;  %v1638_v19 = vpop.f32.mrf.mxu0 }
 0x1cb   : > { %v1927_v20 = vpop.f32.mrf.mxu1 }
 0x1cc   : > { %v1928_v21 = vadd.f32 %v1927_v20, %v1638_v19  ;;  %v1640_v22 = vpop.f32.mrf.mxu0 }
 0x1cd   : > { %v1929_v23 = vpop.f32.mrf.mxu1 }
 0x1ce   : > { %2099 = vst [vmem:[#allocation3] sm:$0xff] %v1928_v21  ;;  %v1643_v24 = vpop.f32.mrf.mxu0 }
 0x1cf   : > { %v1932_v25 = vpop.f32.mrf.mxu1 }
 0x1d0   : > { %v1933_v26 = vadd.f32 %v1932_v25, %v1643_v24  ;;  %v1645_v27 = vpop.f32.mrf.mxu0 }
 0x1d1   : > { %v1934_v28 = vpop.f32.mrf.mxu1 }
 0x1d2   : > { %2100 = vst [vmem:[#allocation3 + $0xf0] sm:$0xff] %v1933_v26  ;;  %v1646_v29 = vpop.f32.mrf.mxu0 }
 0x1d3   : > { %v1935_v30 = vpop.f32.mrf.mxu1 }
 0x1d4   : > { %v1936_v31 = vadd.f32 %v1935_v30, %v1646_v29  ;;  %v1648_v32 = vpop.f32.mrf.mxu0 }
 0x1d5   : > { %v1937_v33 = vpop.f32.mrf.mxu1 }
 0x1d6   : > { %2101 = vst [vmem:[#allocation3 + $0x8] sm:$0xff] %v1936_v31  ;;  %v1651_v34 = vpop.f32.mrf.mxu0 }
 0x1d7   : > { %v1940_v35 = vpop.f32.mrf.mxu1 }
 0x1d8   : > { %v1941_v36 = vadd.f32 %v1940_v35, %v1651_v34  ;;  %v1653_v37 = vpop.f32.mrf.mxu0 }
 0x1d9   : > { %v1942_v38 = vpop.f32.mrf.mxu1 }
 0x1da   : > { %2102 = vst [vmem:[#allocation3 + $0x148] sm:$0xff] %v1941_v36  ;;  %v1654_v39 = vpop.f32.mrf.mxu0 }
 0x1db   : > { %v1943_v40 = vpop.f32.mrf.mxu1 }
 0x1dc   : > { %v1944_v41 = vadd.f32 %v1943_v40, %v1654_v39  ;;  %v1656_v42 = vpop.f32.mrf.mxu0 }
 0x1dd   : > { %v1945_v43 = vpop.f32.mrf.mxu1 }
 0x1de   : > { %2103 = vst [vmem:[#allocation3 + $0x1d0] sm:$0xff] %v1944_v41  ;;  %v1659_v44 = vpop.f32.mrf.mxu0 }
 0x1df   : > { %v1948_v45 = vpop.f32.mrf.mxu1 }
 0x1e0   : > { %v1949_v46 = vadd.f32 %v1948_v45, %v1659_v44  ;;  %v1661_v47 = vpop.f32.mrf.mxu0 }
 0x1e1   : > { %v1950_v48 = vpop.f32.mrf.mxu1 }
 0x1e2   : > { %2104 = vst [vmem:[#allocation3 + $0x100] sm:$0xff] %v1949_v46  ;;  %v1662_v49 = vpop.f32.mrf.mxu0 }
 0x1e3   : > { %v1951_v50 = vpop.f32.mrf.mxu1 }
 0x1e4   : > { %v1952_v51 = vadd.f32 %v1951_v50, %v1662_v49  ;;  %v1664_v52 = vpop.f32.mrf.mxu0 }
 0x1e5   : > { %v1953_v53 = vpop.f32.mrf.mxu1 }
 0x1e6   : > { %2105 = vst [vmem:[#allocation3 + $0xc8] sm:$0xff] %v1952_v51  ;;  %v1667_v54 = vpop.f32.mrf.mxu0 }
 0x1e7   : > { %v1956_v55 = vpop.f32.mrf.mxu1 }
 0x1e8   : > { %v1957_v56 = vadd.f32 %v1956_v55, %v1667_v54  ;;  %v1669_v57 = vpop.f32.mrf.mxu0 }
 0x1e9   : > { %v1958_v58 = vpop.f32.mrf.mxu1 }
 0x1ea   : > { %2106 = vst [vmem:[#allocation3 + $0x40] sm:$0xff] %v1957_v56  ;;  %v1670_v59 = vpop.f32.mrf.mxu0 }
 0x1eb   : > { %v1959_v60 = vpop.f32.mrf.mxu1 }
 0x1ec   : > { %v1960_v61 = vadd.f32 %v1959_v60, %v1670_v59  ;;  %v1672_v62 = vpop.f32.mrf.mxu0 }
 0x1ed   : > { %v1961_v63 = vpop.f32.mrf.mxu1 }
 0x1ee   : > { %2107 = vst [vmem:[#allocation3 + $0x1f8] sm:$0xff] %v1960_v61  ;;  %v1675_v0 = vpop.f32.mrf.mxu0 }
 0x1ef   : > { %v1964_v1 = vpop.f32.mrf.mxu1 }
 0x1f0   : > { %v1965_v2 = vadd.f32 %v1964_v1, %v1675_v0  ;;  %v1677_v3 = vpop.f32.mrf.mxu0 }
 0x1f1   : > { %v1966_v4 = vpop.f32.mrf.mxu1 }
 0x1f2   : > { %2108 = vst [vmem:[#allocation3 + $0x20] sm:$0xff] %v1965_v2  ;;  %v1678_v5 = vpop.f32.mrf.mxu0 }
 0x1f3   : > { %v1967_v6 = vpop.f32.mrf.mxu1 }
 0x1f4   : > { %v1968_v7 = vadd.f32 %v1967_v6, %v1678_v5  ;;  %v1680_v8 = vpop.f32.mrf.mxu0 }
 0x1f5   : > { %v1969_v9 = vpop.f32.mrf.mxu1 }
 0x1f6   : > { %2109 = vst [vmem:[#allocation3 + $0x128] sm:$0xff] %v1968_v7  ;;  %v1683_v10 = vpop.f32.mrf.mxu0 }
 0x1f7   : > { %v1972_v11 = vpop.f32.mrf.mxu1 }
 0x1f8   : > { %v1973_v12 = vadd.f32 %v1972_v11, %v1683_v10  ;;  %v1685_v13 = vpop.f32.mrf.mxu0 }
 0x1f9   : > { %v1974_v14 = vpop.f32.mrf.mxu1 }
 0x1fa   : > { %2110 = vst [vmem:[#allocation3 + $0x1a0] sm:$0xff] %v1973_v12  ;;  %v1686_v15 = vpop.f32.mrf.mxu0 }
 0x1fb   : > { %v1975_v16 = vpop.f32.mrf.mxu1 }
 0x1fc   : > { %v1976_v17 = vadd.f32 %v1975_v16, %v1686_v15  ;;  %v1688_v18 = vpop.f32.mrf.mxu0 }
 0x1fd   : > { %v1977_v19 = vpop.f32.mrf.mxu1 }
 0x1fe   : > { %2111 = vst [vmem:[#allocation3 + $0x1f0] sm:$0xff] %v1976_v17  ;;  %v1691_v20 = vpop.f32.mrf.mxu0 }
 0x1ff   : > { %v1980_v21 = vpop.f32.mrf.mxu1 }
 0x200   : > { %v1981_v22 = vadd.f32 %v1980_v21, %v1691_v20  ;;  %v1693_v23 = vpop.f32.mrf.mxu0 }
 0x201   : > { %v1982_v24 = vpop.f32.mrf.mxu1 }
 0x202   : > { %2112 = vst [vmem:[#allocation3 + $0xe8] sm:$0xff] %v1981_v22  ;;  %v1694_v25 = vpop.f32.mrf.mxu0 }
 0x203   : > { %v1983_v26 = vpop.f32.mrf.mxu1 }
 0x204   : > { %v1984_v27 = vadd.f32 %v1983_v26, %v1694_v25  ;;  %v1696_v28 = vpop.f32.mrf.mxu0 }
 0x205   : > { %v1985_v29 = vpop.f32.mrf.mxu1 }
 0x206   : > { %2113 = vst [vmem:[#allocation3 + $0x78] sm:$0xff] %v1984_v27  ;;  %v1699_v30 = vpop.f32.mrf.mxu0 }
 0x207   : > { %v1988_v31 = vpop.f32.mrf.mxu1 }
 0x208   : > { %v1989_v32 = vadd.f32 %v1988_v31, %v1699_v30  ;;  %v1701_v33 = vpop.f32.mrf.mxu0 }
 0x209   : > { %v1990_v34 = vpop.f32.mrf.mxu1 }
 0x20a   : > { %2114 = vst [vmem:[#allocation3 + $0x70] sm:$0xff] %v1989_v32  ;;  %v1702_v35 = vpop.f32.mrf.mxu0 }
 0x20b   : > { %v1991_v36 = vpop.f32.mrf.mxu1 }
 0x20c   : > { %v1992_v37 = vadd.f32 %v1991_v36, %v1702_v35  ;;  %v1704_v38 = vpop.f32.mrf.mxu0 }
 0x20d   : > { %v1993_v39 = vpop.f32.mrf.mxu1 }
 0x20e   : > { %2115 = vst [vmem:[#allocation3 + $0x90] sm:$0xff] %v1992_v37  ;;  %v1707_v40 = vpop.f32.mrf.mxu0 }
 0x20f   : > { %v1996_v41 = vpop.f32.mrf.mxu1 }
 0x210   : > { %v1997_v42 = vadd.f32 %v1996_v41, %v1707_v40  ;;  %v1709_v43 = vpop.f32.mrf.mxu0 }
 0x211   : > { %v1998_v44 = vpop.f32.mrf.mxu1 }
 0x212   : > { %2116 = vst [vmem:[#allocation3 + $0x1d8] sm:$0xff] %v1997_v42  ;;  %v1710_v45 = vpop.f32.mrf.mxu0 }
 0x213   : > { %v1999_v46 = vpop.f32.mrf.mxu1 }
 0x214   : > { %v2000_v47 = vadd.f32 %v1999_v46, %v1710_v45  ;;  %v1712_v48 = vpop.f32.mrf.mxu0 }
 0x215   : > { %v2001_v49 = vpop.f32.mrf.mxu1 }
 0x216   : > { %2117 = vst [vmem:[#allocation3 + $0xd0] sm:$0xff] %v2000_v47  ;;  %v1715_v50 = vpop.f32.mrf.mxu0 }
 0x217   : > { %v2004_v51 = vpop.f32.mrf.mxu1 }
 0x218   : > { %v2005_v52 = vadd.f32 %v2004_v51, %v1715_v50  ;;  %v1717_v53 = vpop.f32.mrf.mxu0 }
 0x219   : > { %v2006_v54 = vpop.f32.mrf.mxu1 }
 0x21a   : > { %2118 = vst [vmem:[#allocation3 + $0xb8] sm:$0xff] %v2005_v52  ;;  %v1718_v55 = vpop.f32.mrf.mxu0 }
 0x21b   : > { %v2007_v56 = vpop.f32.mrf.mxu1 }
 0x21c   : > { %v2008_v57 = vadd.f32 %v2007_v56, %v1718_v55  ;;  %v1720_v58 = vpop.f32.mrf.mxu0 }
 0x21d   : > { %v2009_v59 = vpop.f32.mrf.mxu1 }
 0x21e   : > { %2119 = vst [vmem:[#allocation3 + $0x88] sm:$0xff] %v2008_v57  ;;  %v1723_v60 = vpop.f32.mrf.mxu0 }
 0x21f   : > { %v2012_v61 = vpop.f32.mrf.mxu1 }
 0x220   : > { %v2013_v62 = vadd.f32 %v2012_v61, %v1723_v60  ;;  %v1725_v63 = vpop.f32.mrf.mxu0 }
 0x221   : > { %v2014_v0 = vpop.f32.mrf.mxu1 }
 0x222   : > { %2120 = vst [vmem:[#allocation3 + $0xa8] sm:$0xff] %v2013_v62  ;;  %v1726_v1 = vpop.f32.mrf.mxu0 }
 0x223   : > { %v2015_v2 = vpop.f32.mrf.mxu1 }
 0x224   : > { %v2016_v3 = vadd.f32 %v2015_v2, %v1726_v1  ;;  %v1728_v4 = vpop.f32.mrf.mxu0 }
 0x225   : > { %v2017_v5 = vpop.f32.mrf.mxu1 }
 0x226   : > { %2121 = vst [vmem:[#allocation3 + $0x1c8] sm:$0xff] %v2016_v3  ;;  %v1731_v6 = vpop.f32.mrf.mxu0 }
 0x227   : > { %v2020_v7 = vpop.f32.mrf.mxu1 }
 0x228   : > { %v2021_v8 = vadd.f32 %v2020_v7, %v1731_v6  ;;  %v1733_v9 = vpop.f32.mrf.mxu0 }
 0x229   : > { %v2022_v10 = vpop.f32.mrf.mxu1 }
 0x22a   : > { %2122 = vst [vmem:[#allocation3 + $0x170] sm:$0xff] %v2021_v8  ;;  %v1734_v11 = vpop.f32.mrf.mxu0 }
 0x22b   : > { %v2023_v12 = vpop.f32.mrf.mxu1 }
 0x22c   : > { %v2024_v13 = vadd.f32 %v2023_v12, %v1734_v11  ;;  %v1736_v14 = vpop.f32.mrf.mxu0 }
 0x22d   : > { %v2025_v15 = vpop.f32.mrf.mxu1 }
 0x22e   : > { %2123 = vst [vmem:[#allocation3 + $0x178] sm:$0xff] %v2024_v13  ;;  %v1739_v16 = vpop.f32.mrf.mxu0 }
 0x22f   : > { %v2028_v17 = vpop.f32.mrf.mxu1 }
 0x230   : > { %v2029_v18 = vadd.f32 %v2028_v17, %v1739_v16  ;;  %v1741_v19 = vpop.f32.mrf.mxu0 }
 0x231   : > { %v2030_v20 = vpop.f32.mrf.mxu1 }
 0x232   : > { %2124 = vst [vmem:[#allocation3 + $0x68] sm:$0xff] %v2029_v18  ;;  %v1742_v21 = vpop.f32.mrf.mxu0 }
 0x233   : > { %v2031_v22 = vpop.f32.mrf.mxu1 }
 0x234   : > { %v2032_v23 = vadd.f32 %v2031_v22, %v1742_v21  ;;  %v1744_v24 = vpop.f32.mrf.mxu0 }
 0x235   : > { %v2033_v25 = vpop.f32.mrf.mxu1 }
 0x236   : > { %2125 = vst [vmem:[#allocation3 + $0x190] sm:$0xff] %v2032_v23  ;;  %v1747_v26 = vpop.f32.mrf.mxu0 }
 0x237   : > { %v2036_v27 = vpop.f32.mrf.mxu1 }
 0x238   : > { %v2037_v28 = vadd.f32 %v2036_v27, %v1747_v26  ;;  %v1749_v29 = vpop.f32.mrf.mxu0 }
 0x239   : > { %v2038_v30 = vpop.f32.mrf.mxu1 }
 0x23a   : > { %2126 = vst [vmem:[#allocation3 + $0x198] sm:$0xff] %v2037_v28  ;;  %v1750_v31 = vpop.f32.mrf.mxu0 }
 0x23b   : > { %v2039_v32 = vpop.f32.mrf.mxu1 }
 0x23c   : > { %v2040_v33 = vadd.f32 %v2039_v32, %v1750_v31  ;;  %v1752_v34 = vpop.f32.mrf.mxu0 }
 0x23d   : > { %v2041_v35 = vpop.f32.mrf.mxu1 }
 0x23e   : > { %2127 = vst [vmem:[#allocation3 + $0x38] sm:$0xff] %v2040_v33  ;;  %v1755_v36 = vpop.f32.mrf.mxu0 }
 0x23f   : > { %v2044_v37 = vpop.f32.mrf.mxu1 }
 0x240   : > { %v2045_v38 = vadd.f32 %v2044_v37, %v1755_v36  ;;  %v1757_v39 = vpop.f32.mrf.mxu0 }
 0x241   : > { %v2046_v40 = vpop.f32.mrf.mxu1 }
 0x242   : > { %2128 = vst [vmem:[#allocation3 + $0xc0] sm:$0xff] %v2045_v38  ;;  %v1758_v41 = vpop.f32.mrf.mxu0 }
 0x243   : > { %v2047_v42 = vpop.f32.mrf.mxu1 }
 0x244   : > { %v2048_v43 = vadd.f32 %v2047_v42, %v1758_v41  ;;  %v1760_v44 = vpop.f32.mrf.mxu0 }
 0x245   : > { %v2049_v45 = vpop.f32.mrf.mxu1 }
 0x246   : > { %2129 = vst [vmem:[#allocation3 + $0x1c0] sm:$0xff] %v2048_v43  ;;  %v1763_v46 = vpop.f32.mrf.mxu0 }
 0x247   : > { %v2052_v47 = vpop.f32.mrf.mxu1 }
 0x248   : > { %v2053_v48 = vadd.f32 %v2052_v47, %v1763_v46  ;;  %v1765_v49 = vpop.f32.mrf.mxu0 }
 0x249   : > { %v2054_v50 = vpop.f32.mrf.mxu1 }
 0x24a   : > { %2130 = vst [vmem:[#allocation3 + $0x158] sm:$0xff] %v2053_v48  ;;  %v1766_v51 = vpop.f32.mrf.mxu0 }
 0x24b   : > { %v2055_v52 = vpop.f32.mrf.mxu1 }
 0x24c   : > { %v2056_v53 = vadd.f32 %v2055_v52, %v1766_v51  ;;  %v1768_v54 = vpop.f32.mrf.mxu0 }
 0x24d   : > { %v2057_v55 = vpop.f32.mrf.mxu1 }
 0x24e   : > { %2131 = vst [vmem:[#allocation3 + $0x10] sm:$0xff] %v2056_v53  ;;  %v1771_v56 = vpop.f32.mrf.mxu0 }
 0x24f   : > { %v2060_v57 = vpop.f32.mrf.mxu1 }
 0x250   : > { %v2061_v58 = vadd.f32 %v2060_v57, %v1771_v56  ;;  %v1773_v59 = vpop.f32.mrf.mxu0 }
 0x251   : > { %v2062_v60 = vpop.f32.mrf.mxu1 }
 0x252   : > { %2132 = vst [vmem:[#allocation3 + $0x58] sm:$0xff] %v2061_v58  ;;  %v1774_v61 = vpop.f32.mrf.mxu0  ;;  %2336 = sbr.rel (%p3427_p5) target bundleno = 626 (0x272), region = 68 }
 0x253   : > { %v2063_v62 = vpop.f32.mrf.mxu1 }
 0x254   : > { %v2064_v63 = vadd.f32 %v2063_v62, %v1774_v61  ;;  %v1776_v0 = vpop.f32.mrf.mxu0 }
 0x255   : > { %v2065_v1 = vpop.f32.mrf.mxu1 }
 0x256   : > { %2133 = vst [vmem:[#allocation3 + $0xa0] sm:$0xff] %v2064_v63 }
 0x257   : > { %v2337_v2 = vld [vmem:[#allocation3 + $0xb0] sm:$0xff]  ;;  %v2339_v4 = vld [vmem:[#allocation3 + $0xd8] sm:$0xff]  ;;  %v2342_v8 = vld [vmem:[#allocation3 + $0x168] sm:$0xff] }
 0x258   : > { %v2338_v3 = vld [vmem:[#allocation3 + $0x1b0] sm:$0xff]  ;;  %v2340_v6 = vld [vmem:[#allocation3 + $0x18] sm:$0xff]  ;;  %v2344_v12 = vld [vmem:[#allocation3 + $0x48] sm:$0xff] }
 0x259   : > { %v3575_v5 = vpack.c.bf16 %v2338_v3, %v2337_v2  ;;  %v2341_v7 = vld [vmem:[#allocation3 + $0x50] sm:$0xff]  ;;  %v3580_v9 = vpack.c.bf16 %v2340_v6, %v2339_v4  ;;  %v2345_v13 = vld [vmem:[#allocation3 + $0x180] sm:$0xff]  ;;  %v2347_v16 = vld [vmem:[#allocation3 + $0x118] sm:$0xff] }
 0x25a   : > { %v3585_v10 = vpack.c.bf16 %v2342_v8, %v2341_v7  ;;  %v2343_v11 = vld [vmem:[#allocation3 + $0x130] sm:$0xff]  ;;  %v2348_v17 = vld [vmem:[#allocation3 + $0x98] sm:$0xff]  ;;  %v2349_v20 = vld [vmem:[#allocation3 + $0x120] sm:$0xff] }
 0x25b   : > { %3576 = vst [vmem:[%s4387_s6] sm:$0xff] %v3575_v5   ;;  %v3590_v14 = vpack.c.bf16 %v2344_v12, %v2343_v11  ;;  %v2346_v15 = vld [vmem:[#allocation3 + $0x110] sm:$0xff]  ;;  %3732 = vst [vmem:[%s4387_s6 + $0x8] sm:$0xff] %v3580_v9   ;;  %v3600_v19 = vpack.c.bf16 %v2348_v17, %v2347_v16  ;;  %v2351_v22 = vld [vmem:[#allocation3 + $0x108] sm:$0xff] }
 0x25c   : > { %3733 = vst [vmem:[%s4387_s6 + $0x10] sm:$0xff] %v3585_v10   ;;  %v3595_v18 = vpack.c.bf16 %v2346_v15, %v2345_v13  ;;  %v2350_v21 = vld [vmem:[#allocation3 + $0x150] sm:$0xff]  ;;  %v2352_v24 = vld [vmem:[#allocation3 + $0x60] sm:$0xff]  ;;  %v2354_v26 = vld [vmem:[#allocation3 + $0x188] sm:$0xff] }
 0x25d   : > { %3734 = vst [vmem:[%s4387_s6 + $0x18] sm:$0xff] %v3590_v14   ;;  %v3605_v23 = vpack.c.bf16 %v2350_v21, %v2349_v20  ;;  %v2353_v25 = vld [vmem:[#allocation3 + $0xe0] sm:$0xff]  ;;  %3736 = vst [vmem:[%s4387_s6 + $0x28] sm:$0xff] %v3600_v19   ;;  %v3610_v27 = vpack.c.bf16 %v2352_v24, %v2351_v22  ;;  %v2355_v29 = vld [vmem:[#allocation3 + $0x138] sm:$0xff] }
 0x25e   : > { %3735 = vst [vmem:[%s4387_s6 + $0x20] sm:$0xff] %v3595_v18   ;;  %v3615_v28 = vpack.c.bf16 %v2354_v26, %v2353_v25  ;;  %v2356_v30 = vld [vmem:[#allocation3 + $0x140] sm:$0xff]  ;;  %v2358_v33 = vld [vmem:[#allocation3 + $0x1a8] sm:$0xff]  ;;  %v2359_v34 = vld [vmem:[#allocation3 + $0x1b8] sm:$0xff] }
 0x25f   : > { %v2357_v31 = vld [vmem:[#allocation3 + $0x80] sm:$0xff]  ;;  %3737 = vst [vmem:[%s4387_s6 + $0x30] sm:$0xff] %v3605_v23   ;;  %v3620_v32 = vpack.c.bf16 %v2356_v30, %v2355_v29  ;;  %v2360_v35 = vld [vmem:[#allocation3 + $0x28] sm:$0xff]  ;;  %3738 = vst [vmem:[%s4387_s6 + $0x38] sm:$0xff] %v3610_v27  }
 0x260   : > { %3739 = vst [vmem:[%s4387_s6 + $0x40] sm:$0xff] %v3615_v28   ;;  %v3625_v36 = vpack.c.bf16 %v2358_v33, %v2357_v31  ;;  %v3630_v37 = vpack.c.bf16 %v2360_v35, %v2359_v34  ;;  %v2361_v38 = vld [vmem:[#allocation3 + $0x1e8] sm:$0xff]  ;;  %v2362_v39 = vld [vmem:[#allocation3 + $0xf8] sm:$0xff]  ;;  %v2363_v40 = vld [vmem:[#allocation3 + $0x160] sm:$0xff] }
 0x261   : > { %3740 = vst [vmem:[%s4387_s6 + $0x48] sm:$0xff] %v3620_v32   ;;  %v3635_v41 = vpack.c.bf16 %v2362_v39, %v2361_v38  ;;  %v2364_v42 = vld [vmem:[#allocation3 + $0x30] sm:$0xff]  ;;  %v2365_v43 = vld [vmem:[#allocation3 + $0x1e0] sm:$0xff]  ;;  %v2368_v48 = vld [vmem:[#allocation3 + $0x8] sm:$0xff] }
 0x262   : > { %v2366_v44 = vld [vmem:[#allocation3] sm:$0xff]  ;;  %3741 = vst [vmem:[%s4387_s6 + $0x50] sm:$0xff] %v3625_v36   ;;  %3742 = vst [vmem:[%s4387_s6 + $0x58] sm:$0xff] %v3630_v37   ;;  %v3640_v45 = vpack.c.bf16 %v2364_v42, %v2363_v40  ;;  %v2367_v47 = vld [vmem:[#allocation3 + $0xf0] sm:$0xff] }
 0x263   : > { %v3645_v46 = vpack.c.bf16 %v2366_v44, %v2365_v43  ;;  %v2369_v49 = vld [vmem:[#allocation3 + $0x148] sm:$0xff]  ;;  %3743 = vst [vmem:[%s4387_s6 + $0x60] sm:$0xff] %v3635_v41   ;;  %v3650_v50 = vpack.c.bf16 %v2368_v48, %v2367_v47  ;;  %v2370_v51 = vld [vmem:[#allocation3 + $0x1d0] sm:$0xff]  ;;  %v2371_v52 = vld [vmem:[#allocation3 + $0x100] sm:$0xff] }
 0x264   : > { %v2372_v53 = vld [vmem:[#allocation3 + $0xc8] sm:$0xff]  ;;  %3744 = vst [vmem:[%s4387_s6 + $0x68] sm:$0xff] %v3640_v45   ;;  %v3655_v54 = vpack.c.bf16 %v2370_v51, %v2369_v49  ;;  %v2373_v56 = vld [vmem:[#allocation3 + $0x40] sm:$0xff]  ;;  %v2374_v57 = vld [vmem:[#allocation3 + $0x1f8] sm:$0xff] }
 0x265   : > { %3745 = vst [vmem:[%s4387_s6 + $0x70] sm:$0xff] %v3645_v46   ;;  %v3660_v55 = vpack.c.bf16 %v2372_v53, %v2371_v52  ;;  %v2375_v58 = vld [vmem:[#allocation3 + $0x20] sm:$0xff]  ;;  %3746 = vst [vmem:[%s4387_s6 + $0x78] sm:$0xff] %v3650_v50   ;;  %v3665_v59 = vpack.c.bf16 %v2374_v57, %v2373_v56  ;;  %v2376_v60 = vld [vmem:[#allocation3 + $0x128] sm:$0xff] }
 0x266   : > { %v2377_v61 = vld [vmem:[#allocation3 + $0x1a0] sm:$0xff]  ;;  %v2378_v62 = vld [vmem:[#allocation3 + $0x1f0] sm:$0xff]  ;;  %3747 = vst [vmem:[%s4387_s6 + $0x80] sm:$0xff] %v3655_v54   ;;  %v3670_v63 = vpack.c.bf16 %v2376_v60, %v2375_v58  ;;  %v2379_v1 = vld [vmem:[#allocation3 + $0xe8] sm:$0xff] }
 0x267   : > { %3748 = vst [vmem:[%s4387_s6 + $0x88] sm:$0xff] %v3660_v55   ;;  %v3675_v0 = vpack.c.bf16 %v2378_v62, %v2377_v61  ;;  %v2380_v2 = vld [vmem:[#allocation3 + $0x78] sm:$0xff]  ;;  %v2381_v3 = vld [vmem:[#allocation3 + $0x70] sm:$0xff]  ;;  %3749 = vst [vmem:[%s4387_s6 + $0x90] sm:$0xff] %v3665_v59  }
 0x268   : > { %v3680_v4 = vpack.c.bf16 %v2380_v2, %v2379_v1  ;;  %v2382_v5 = vld [vmem:[#allocation3 + $0x90] sm:$0xff]  ;;  %v2383_v6 = vld [vmem:[#allocation3 + $0x1d8] sm:$0xff]  ;;  %3750 = vst [vmem:[%s4387_s6 + $0x98] sm:$0xff] %v3670_v63   ;;  %v2386_v11 = vld [vmem:[#allocation3 + $0x88] sm:$0xff] }
 0x269   : > { %v2384_v7 = vld [vmem:[#allocation3 + $0xd0] sm:$0xff]  ;;  %3751 = vst [vmem:[%s4387_s6 + $0xa0] sm:$0xff] %v3675_v0   ;;  %v3685_v8 = vpack.c.bf16 %v2382_v5, %v2381_v3  ;;  %v2385_v10 = vld [vmem:[#allocation3 + $0xb8] sm:$0xff]  ;;  %v2387_v12 = vld [vmem:[#allocation3 + $0xa8] sm:$0xff] }
 0x26a   : > { %v3690_v9 = vpack.c.bf16 %v2384_v7, %v2383_v6  ;;  %3752 = vst [vmem:[%s4387_s6 + $0xa8] sm:$0xff] %v3680_v4   ;;  %v3695_v13 = vpack.c.bf16 %v2386_v11, %v2385_v10  ;;  %v2388_v14 = vld [vmem:[#allocation3 + $0x1c8] sm:$0xff]  ;;  %v2389_v15 = vld [vmem:[#allocation3 + $0x170] sm:$0xff]  ;;  %v2390_v16 = vld [vmem:[#allocation3 + $0x178] sm:$0xff] }
 0x26b   : > { %3753 = vst [vmem:[%s4387_s6 + $0xb0] sm:$0xff] %v3685_v8   ;;  %v3700_v17 = vpack.c.bf16 %v2388_v14, %v2387_v12  ;;  %v3705_v18 = vpack.c.bf16 %v2390_v16, %v2389_v15  ;;  %v2391_v19 = vld [vmem:[#allocation3 + $0x68] sm:$0xff]  ;;  %v2392_v20 = vld [vmem:[#allocation3 + $0x190] sm:$0xff]  ;;  %v2393_v21 = vld [vmem:[#allocation3 + $0x198] sm:$0xff] }
 0x26c   : > { %3754 = vst [vmem:[%s4387_s6 + $0xb8] sm:$0xff] %v3690_v9   ;;  %3755 = vst [vmem:[%s4387_s6 + $0xc0] sm:$0xff] %v3695_v13   ;;  %v3710_v22 = vpack.c.bf16 %v2392_v20, %v2391_v19  ;;  %v2394_v23 = vld [vmem:[#allocation3 + $0x38] sm:$0xff]  ;;  %v2395_v24 = vld [vmem:[#allocation3 + $0xc0] sm:$0xff] }
 0x26d   : > { %v2396_v25 = vld [vmem:[#allocation3 + $0x1c0] sm:$0xff]  ;;  %3756 = vst [vmem:[%s4387_s6 + $0xc8] sm:$0xff] %v3700_v17   ;;  %3757 = vst [vmem:[%s4387_s6 + $0xd0] sm:$0xff] %v3705_v18   ;;  %v3715_v26 = vpack.c.bf16 %v2394_v23, %v2393_v21  ;;  %v2397_v28 = vld [vmem:[#allocation3 + $0x158] sm:$0xff] }
 0x26e   : > { %v3720_v27 = vpack.c.bf16 %v2396_v25, %v2395_v24  ;;  %v2398_v29 = vld [vmem:[#allocation3 + $0x10] sm:$0xff]  ;;  %v2399_v30 = vld [vmem:[#allocation3 + $0x58] sm:$0xff]  ;;  %3758 = vst [vmem:[%s4387_s6 + $0xd8] sm:$0xff] %v3710_v22   ;;  %v2400_v32 = vld [vmem:[#allocation3 + $0xa0] sm:$0xff] }
 0x26f   : > { %v3725_v31 = vpack.c.bf16 %v2398_v29, %v2397_v28  ;;  %3759 = vst [vmem:[%s4387_s6 + $0xe0] sm:$0xff] %v3715_v26   ;;  %v3730_v33 = vpack.c.bf16 %v2400_v32, %v2399_v30 }
 0x270   : > { %3760 = vst [vmem:[%s4387_s6 + $0xe8] sm:$0xff] %v3720_v27  }
 0x271   : > { %3761 = vst [vmem:[%s4387_s6 + $0xf0] sm:$0xff] %v3725_v31   ;;  %3762 = vst [vmem:[%s4387_s6 + $0xf8] sm:$0xff] %v3730_v33  }
 0x272 PF: > { %p3494_p9 = scmp.ne.s32.totalorder %s4194_s15, 2 }
 0x274   : > { %2728 = sbr.rel (%p3494_p9) target bundleno = 884 (0x374), region = 72 }
 0x279   : > { %v2759_v34 = vld [vmem:[#allocation3 + $0xf0] sm:$0xff]  ;;  %v2760_v35 = vld [vmem:[#allocation3 + $0x8] sm:$0xff]  ;;  %v4425_v36 = vld [vmem:[%s4528_s2] ss:$0 sm:$0xff]  ;;  %v2974_v37 = vlaneseq  ;;  %v4212_v43 = vmov 1966171168  }
 0x27a   : > { %v2830_v38 = vadd.f32 %v4425_v36, %v2759_v34  ;;  %v2831_v39 = vadd.f32 %v4425_v36, %v2760_v35  ;;  %v2791_v40 = vld [vmem:[#allocation3 + $0x58] sm:$0xff]  ;;  %v2792_v41 = vld [vmem:[#allocation3 + $0xa0] sm:$0xff]  ;;  %v2743_v42 = vld [vmem:[#allocation3 + $0x108] sm:$0xff]  ;;  %v4429_v44 = vunpack.c.l.s4 %v4212_v43 }
 0x27b   : > { %v2862_v45 = vadd.f32 %v4425_v36, %v2791_v40  ;;  %v2863_v46 = vadd.f32 %v4425_v36, %v2792_v41  ;;  %v2744_v47 = vld [vmem:[#allocation3 + $0x60] sm:$0xff]  ;;  %v2814_v48 = vadd.f32 %v4425_v36, %v2743_v42  ;;  %v2775_v49 = vld [vmem:[#allocation3 + $0x1d8] sm:$0xff]  ;;  %v2776_v50 = vld [vmem:[#allocation3 + $0xd0] sm:$0xff]  ;;  %v4434_v51 = vshrl.u32 %v2974_v37, 7 }
 0x27c   : > { %v2894_v52 = vmax.f32 %v2830_v38, 0.0  ;;  %v2895_v53 = vmax.f32 %v2831_v39, 0.0  ;;  %v2815_v54 = vadd.f32 %v4425_v36, %v2744_v47  ;;  %v2846_v55 = vadd.f32 %v4425_v36, %v2775_v49  ;;  %v2757_v56 = vld [vmem:[#allocation3 + $0x1e0] sm:$0xff]  ;;  %v2789_v58 = vld [vmem:[#allocation3 + $0x158] sm:$0xff]  ;;  %v2790_v63 = vld [vmem:[#allocation3 + $0x10] sm:$0xff] }
 0x27d   : > { %v2758_v57 = vld [vmem:[#allocation3] sm:$0xff]  ;;  %v2926_v59 = vmax.f32 %v2862_v45, 0.0  ;;  %v2927_v60 = vmax.f32 %v2863_v46, 0.0  ;;  %v2878_v61 = vmax.f32 %v2814_v48, 0.0  ;;  %v2847_v62 = vadd.f32 %v4425_v36, %v2776_v50  ;;  %v2742_v5 = vld [vmem:[#allocation3 + $0x150] sm:$0xff]  ;;  %v2739_v32 = vld [vmem:[#allocation3 + $0x118] sm:$0xff] }
 0x27e   : > { %v2741_v0 = vld [vmem:[#allocation3 + $0x120] sm:$0xff]  ;;  %v2945_v1 = vpack.c.bf16 %v2895_v53, %v2894_v52  ;;  %v2879_v2 = vmax.f32 %v2815_v54, 0.0  ;;  %v2910_v3 = vmax.f32 %v2846_v55, 0.0  ;;  %v2828_v4 = vadd.f32 %v4425_v36, %v2757_v56  ;;  %v2773_v10 = vld [vmem:[#allocation3 + $0x70] sm:$0xff]  ;;  %v2740_v33 = vld [vmem:[#allocation3 + $0x98] sm:$0xff] }
 0x27f   : > { %v2961_v6 = vpack.c.bf16 %v2927_v60, %v2926_v59  ;;  %v2911_v7 = vmax.f32 %v2847_v62, 0.0  ;;  %v2829_v8 = vadd.f32 %v4425_v36, %v2758_v57  ;;  %v2860_v9 = vadd.f32 %v4425_v36, %v2789_v58  ;;  %v2774_v11 = vld [vmem:[#allocation3 + $0x90] sm:$0xff]  ;;  %v2755_v16 = vld [vmem:[#allocation3 + $0x160] sm:$0xff]  ;;  %v2771_v39 = vld [vmem:[#allocation3 + $0xe8] sm:$0xff] }
 0x280   : > { %3763 = vmatprep.subr.bf16.mxu0 %v2945_v1  ;;  %v2937_v12 = vpack.c.bf16 %v2879_v2, %v2878_v61  ;;  %v2892_v13 = vmax.f32 %v2828_v4, 0.0  ;;  %v2861_v14 = vadd.f32 %v4425_v36, %v2790_v63  ;;  %v2812_v15 = vadd.f32 %v4425_v36, %v2741_v0  ;;  %v2756_v17 = vld [vmem:[#allocation3 + $0x30] sm:$0xff]  ;;  %v2787_v22 = vld [vmem:[#allocation3 + $0xc0] sm:$0xff]  ;;  %v2772_v40 = vld [vmem:[#allocation3 + $0x78] sm:$0xff] }
 0x281   : > { %3785 = vmatprep.subr.bf16.mxu1 %v2961_v6  ;;  %v2953_v18 = vpack.c.bf16 %v2911_v7, %v2910_v3  ;;  %v2893_v19 = vmax.f32 %v2829_v8, 0.0  ;;  %v2924_v20 = vmax.f32 %v2860_v9, 0.0  ;;  %v2813_v21 = vadd.f32 %v4425_v36, %v2742_v5  ;;  %v2788_v27 = vld [vmem:[#allocation3 + $0x1c0] sm:$0xff]  ;;  %v2753_v46 = vld [vmem:[#allocation3 + $0x1e8] sm:$0xff]  ;;  %v2754_v47 = vld [vmem:[#allocation3 + $0xf8] sm:$0xff] }
 0x282   : > { %3764 = vmatpush3.bf16.msra.mxu0 %v2937_v12  ;;  %v2925_v23 = vmax.f32 %v2861_v14, 0.0  ;;  %v2876_v24 = vmax.f32 %v2812_v15, 0.0  ;;  %v2844_v25 = vadd.f32 %v4425_v36, %v2773_v10  ;;  %v2845_v26 = vadd.f32 %v4425_v36, %v2774_v11  ;;  %v2785_v53 = vld [vmem:[#allocation3 + $0x198] sm:$0xff]  ;;  %v2737_v63 = vld [vmem:[#allocation3 + $0x180] sm:$0xff]  ;;  %v2738_v0 = vld [vmem:[#allocation3 + $0x110] sm:$0xff] }
 0x283   : > { %3786 = vmatpush3.bf16.msra.mxu1 %v2953_v18  ;;  %v2944_v28 = vpack.c.bf16 %v2893_v19, %v2892_v13  ;;  %v2877_v29 = vmax.f32 %v2813_v21, 0.0  ;;  %v2826_v30 = vadd.f32 %v4425_v36, %v2755_v16  ;;  %v2827_v31 = vadd.f32 %v4425_v36, %v2756_v17  ;;  %v2786_v58 = vld [vmem:[#allocation3 + $0x38] sm:$0xff]  ;;  %v2769_v5 = vld [vmem:[#allocation3 + $0x1a0] sm:$0xff]  ;;  %v2770_v6 = vld [vmem:[#allocation3 + $0x1f0] sm:$0xff] }
 0x284   : > { %v2960_v34 = vpack.c.bf16 %v2925_v23, %v2924_v20  ;;  %v2908_v35 = vmax.f32 %v2844_v25, 0.0  ;;  %v2909_v37 = vmax.f32 %v2845_v26, 0.0  ;;  %v2858_v38 = vadd.f32 %v4425_v36, %v2787_v22  ;;  %v2751_v11 = vld [vmem:[#allocation3 + $0x1b8] sm:$0xff]  ;;  %v2752_v12 = vld [vmem:[#allocation3 + $0x28] sm:$0xff]  ;;  %v2784_v22 = vld [vmem:[#allocation3 + $0x190] sm:$0xff] }
 0x285   : > { %3765 = vmatprep.subr.bf16.mxu0 %v2944_v28  ;;  %v2936_v41 = vpack.c.bf16 %v2877_v29, %v2876_v24  ;;  %v2890_v42 = vmax.f32 %v2826_v30, 0.0  ;;  %v2891_v43 = vmax.f32 %v2827_v31, 0.0  ;;  %v2859_v45 = vadd.f32 %v4425_v36, %v2788_v27  ;;  %v2783_v17 = vld [vmem:[#allocation3 + $0x68] sm:$0xff]  ;;  %v2735_v27 = vld [vmem:[#allocation3 + $0x130] sm:$0xff] }
 0x286   : > { %3787 = vmatprep.subr.bf16.mxu1 %v2960_v34  ;;  %v2952_v48 = vpack.c.bf16 %v2909_v37, %v2908_v35  ;;  %v2922_v49 = vmax.f32 %v2858_v38, 0.0  ;;  %v2810_v50 = vadd.f32 %v4425_v36, %v2739_v32  ;;  %v2811_v52 = vadd.f32 %v4425_v36, %v2740_v33  ;;  %v2736_v28 = vld [vmem:[#allocation3 + $0x48] sm:$0xff]  ;;  %v2767_v33 = vld [vmem:[#allocation3 + $0x20] sm:$0xff] }
 0x287   : > { %3766 = vmatpush3.bf16.msra.mxu0 %v2936_v41  ;;  %v2943_v54 = vpack.c.bf16 %v2891_v43, %v2890_v42  ;;  %v2923_v55 = vmax.f32 %v2859_v45, 0.0  ;;  %v2842_v56 = vadd.f32 %v4425_v36, %v2771_v39  ;;  %v2843_v57 = vadd.f32 %v4425_v36, %v2772_v40  ;;  %v2768_v34 = vld [vmem:[#allocation3 + $0x128] sm:$0xff]  ;;  %v2749_v40 = vld [vmem:[#allocation3 + $0x80] sm:$0xff] }
 0x288   : > { %3788 = vmatpush3.bf16.msra.mxu1 %v2952_v48  ;;  %v2874_v59 = vmax.f32 %v2810_v50, 0.0  ;;  %v2875_v60 = vmax.f32 %v2811_v52, 0.0  ;;  %v2824_v61 = vadd.f32 %v4425_v36, %v2753_v46  ;;  %v2825_v62 = vadd.f32 %v4425_v36, %v2754_v47  ;;  %v2750_v41 = vld [vmem:[#allocation3 + $0x1a8] sm:$0xff]  ;;  %v2781_v47 = vld [vmem:[#allocation3 + $0x170] sm:$0xff] }
 0x289   : > { %3767 = vmatprep.subr.bf16.mxu0 %v2943_v54  ;;  %v2959_v1 = vpack.c.bf16 %v2923_v55, %v2922_v49  ;;  %v2906_v2 = vmax.f32 %v2842_v56, 0.0  ;;  %v2907_v3 = vmax.f32 %v2843_v57, 0.0  ;;  %v2856_v4 = vadd.f32 %v4425_v36, %v2785_v53  ;;  %v2782_v53 = vld [vmem:[#allocation3 + $0x178] sm:$0xff] }
 0x28a   : > { %v2935_v7 = vpack.c.bf16 %v2875_v60, %v2874_v59  ;;  %v2888_v8 = vmax.f32 %v2824_v61, 0.0  ;;  %v2889_v9 = vmax.f32 %v2825_v62, 0.0  ;;  %v2857_v10 = vadd.f32 %v4425_v36, %v2786_v58  ;;  %v2733_v58 = vld [vmem:[#allocation3 + $0x50] sm:$0xff]  ;;  %v2734_v59 = vld [vmem:[#allocation3 + $0x168] sm:$0xff] }
 0x28b   : > { %3789 = vmatprep.subr.bf16.mxu1 %v2959_v1  ;;  %v2951_v13 = vpack.c.bf16 %v2907_v3, %v2906_v2  ;;  %v2920_v14 = vmax.f32 %v2856_v4, 0.0  ;;  %v2808_v15 = vadd.f32 %v4425_v36, %v2737_v63  ;;  %v2809_v16 = vadd.f32 %v4425_v36, %v2738_v0  ;;  %v2765_v0 = vld [vmem:[#allocation3 + $0x40] sm:$0xff]  ;;  %v2766_v1 = vld [vmem:[#allocation3 + $0x1f8] sm:$0xff] }
 0x28c   : > { %3768 = vmatpush3.bf16.msra.mxu0 %v2935_v7  ;;  %v2942_v18 = vpack.c.bf16 %v2889_v9, %v2888_v8  ;;  %v2921_v19 = vmax.f32 %v2857_v10, 0.0  ;;  %v2840_v20 = vadd.f32 %v4425_v36, %v2769_v5  ;;  %v2841_v21 = vadd.f32 %v4425_v36, %v2770_v6  ;;  %v2747_v6 = vld [vmem:[#allocation3 + $0x138] sm:$0xff]  ;;  %v2748_v7 = vld [vmem:[#allocation3 + $0x140] sm:$0xff] }
 0x28d   : > { %3790 = vmatpush3.bf16.msra.mxu1 %v2951_v13  ;;  %v2872_v23 = vmax.f32 %v2808_v15, 0.0  ;;  %v2873_v24 = vmax.f32 %v2809_v16, 0.0  ;;  %v2822_v25 = vadd.f32 %v4425_v36, %v2751_v11  ;;  %v2823_v26 = vadd.f32 %v4425_v36, %v2752_v12  ;;  %v2779_v12 = vld [vmem:[#allocation3 + $0xa8] sm:$0xff] }
 0x28e   : > { %3769 = vmatprep.subr.bf16.mxu0 %v2942_v18  ;;  %v2958_v29 = vpack.c.bf16 %v2921_v19, %v2920_v14  ;;  %v2904_v30 = vmax.f32 %v2840_v20, 0.0  ;;  %v2905_v31 = vmax.f32 %v2841_v21, 0.0  ;;  %v2854_v32 = vadd.f32 %v4425_v36, %v2783_v17  ;;  %v2780_v17 = vld [vmem:[#allocation3 + $0x1c8] sm:$0xff] }
 0x28f   : > { %v2934_v35 = vpack.c.bf16 %v2873_v24, %v2872_v23  ;;  %v2886_v37 = vmax.f32 %v2822_v25, 0.0  ;;  %v2887_v38 = vmax.f32 %v2823_v26, 0.0  ;;  %v2855_v39 = vadd.f32 %v4425_v36, %v2784_v22  ;;  %v2731_v22 = vld [vmem:[#allocation3 + $0xd8] sm:$0xff] }
 0x290   : > { %3791 = vmatprep.subr.bf16.mxu1 %v2958_v29  ;;  %v2950_v42 = vpack.c.bf16 %v2905_v31, %v2904_v30  ;;  %v2918_v43 = vmax.f32 %v2854_v32, 0.0  ;;  %v2806_v45 = vadd.f32 %v4425_v36, %v2735_v27  ;;  %v2807_v46 = vadd.f32 %v4425_v36, %v2736_v28  ;;  %v2732_v23 = vld [vmem:[#allocation3 + $0x18] sm:$0xff]  ;;  %v2763_v28 = vld [vmem:[#allocation3 + $0x100] sm:$0xff]  ;;  %v2764_v29 = vld [vmem:[#allocation3 + $0xc8] sm:$0xff] }
 0x291   : > { %3770 = vmatpush3.bf16.msra.mxu0 %v2934_v35  ;;  %v2941_v48 = vpack.c.bf16 %v2887_v38, %v2886_v37  ;;  %v2919_v49 = vmax.f32 %v2855_v39, 0.0  ;;  %v2838_v50 = vadd.f32 %v4425_v36, %v2767_v33  ;;  %v2839_v52 = vadd.f32 %v4425_v36, %v2768_v34  ;;  %v2745_v34 = vld [vmem:[#allocation3 + $0xe0] sm:$0xff]  ;;  %v2746_v35 = vld [vmem:[#allocation3 + $0x188] sm:$0xff] }
 0x292   : > { %3792 = vmatpush3.bf16.msra.mxu1 %v2950_v42  ;;  %v2870_v54 = vmax.f32 %v2806_v45, 0.0  ;;  %v2871_v55 = vmax.f32 %v2807_v46, 0.0  ;;  %v2820_v56 = vadd.f32 %v4425_v36, %v2749_v40  ;;  %v2821_v57 = vadd.f32 %v4425_v36, %v2750_v41  ;;  %v2777_v41 = vld [vmem:[#allocation3 + $0xb8] sm:$0xff] }
 0x293   : > { %3771 = vmatprep.subr.bf16.mxu0 %v2941_v48  ;;  %v2957_v60 = vpack.c.bf16 %v2919_v49, %v2918_v43  ;;  %v2902_v61 = vmax.f32 %v2838_v50, 0.0  ;;  %v2903_v62 = vmax.f32 %v2839_v52, 0.0  ;;  %v2852_v63 = vadd.f32 %v4425_v36, %v2781_v47  ;;  %v2778_v47 = vld [vmem:[#allocation3 + $0x88] sm:$0xff] }
 0x294   : > { %v2933_v2 = vpack.c.bf16 %v2871_v55, %v2870_v54  ;;  %v2884_v3 = vmax.f32 %v2820_v56, 0.0  ;;  %v2885_v4 = vmax.f32 %v2821_v57, 0.0  ;;  %v2853_v5 = vadd.f32 %v4425_v36, %v2782_v53  ;;  %v2729_v53 = vld [vmem:[#allocation3 + $0xb0] sm:$0xff] }
 0x295   : > { %3793 = vmatprep.subr.bf16.mxu1 %v2957_v60  ;;  %v2949_v8 = vpack.c.bf16 %v2903_v62, %v2902_v61  ;;  %v2916_v9 = vmax.f32 %v2852_v63, 0.0  ;;  %v2804_v10 = vadd.f32 %v4425_v36, %v2733_v58  ;;  %v2805_v11 = vadd.f32 %v4425_v36, %v2734_v59  ;;  %v2730_v54 = vld [vmem:[#allocation3 + $0x1b0] sm:$0xff]  ;;  %v2761_v59 = vld [vmem:[#allocation3 + $0x148] sm:$0xff] }
 0x296   : > { %3772 = vmatpush3.bf16.msra.mxu0 %v2933_v2  ;;  %v2940_v13 = vpack.c.bf16 %v2885_v4, %v2884_v3  ;;  %v2917_v14 = vmax.f32 %v2853_v5, 0.0  ;;  %v2836_v15 = vadd.f32 %v4425_v36, %v2765_v0  ;;  %v2837_v16 = vadd.f32 %v4425_v36, %v2766_v1  ;;  %v2762_v60 = vld [vmem:[#allocation3 + $0x1d0] sm:$0xff]  ;;  %v3496_v1 = vld.sshfl [vmem:[%s4529_s3] sm:$0x33 pattern:$0x75316420] }
 0x297   : > { %3794 = vmatpush3.bf16.msra.mxu1 %v2949_v8  ;;  %v2868_v18 = vmax.f32 %v2804_v10, 0.0  ;;  %v2869_v19 = vmax.f32 %v2805_v11, 0.0  ;;  %v2818_v20 = vadd.f32 %v4425_v36, %v2747_v6  ;;  %v2819_v21 = vadd.f32 %v4425_v36, %v2748_v7 }
 0x298   : > { %3773 = vmatprep.subr.bf16.mxu0 %v2940_v13  ;;  %v2956_v24 = vpack.c.bf16 %v2917_v14, %v2916_v9  ;;  %v2900_v25 = vmax.f32 %v2836_v15, 0.0  ;;  %v2901_v26 = vmax.f32 %v2837_v16, 0.0  ;;  %v2850_v27 = vadd.f32 %v4425_v36, %v2779_v12 }
 0x299   : > { %v2932_v30 = vpack.c.bf16 %v2869_v19, %v2868_v18  ;;  %v2882_v31 = vmax.f32 %v2818_v20, 0.0  ;;  %v2883_v32 = vmax.f32 %v2819_v21, 0.0  ;;  %v2851_v33 = vadd.f32 %v4425_v36, %v2780_v17 }
 0x29a   : > { %3795 = vmatprep.subr.bf16.mxu1 %v2956_v24  ;;  %v2948_v37 = vpack.c.bf16 %v2901_v26, %v2900_v25  ;;  %v2914_v38 = vmax.f32 %v2850_v27, 0.0  ;;  %v2802_v39 = vadd.f32 %v4425_v36, %v2731_v22  ;;  %v2803_v40 = vadd.f32 %v4425_v36, %v2732_v23 }
 0x29b   : > { %3774 = vmatpush3.bf16.msra.mxu0 %v2932_v30  ;;  %v2939_v42 = vpack.c.bf16 %v2883_v32, %v2882_v31  ;;  %v2915_v43 = vmax.f32 %v2851_v33, 0.0  ;;  %v2834_v45 = vadd.f32 %v4425_v36, %v2763_v28  ;;  %v2835_v46 = vadd.f32 %v4425_v36, %v2764_v29 }
 0x29c   : > { %3796 = vmatpush3.bf16.msra.mxu1 %v2948_v37  ;;  %v2866_v48 = vmax.f32 %v2802_v39, 0.0  ;;  %v2867_v49 = vmax.f32 %v2803_v40, 0.0  ;;  %v2816_v50 = vadd.f32 %v4425_v36, %v2745_v34  ;;  %v2817_v52 = vadd.f32 %v4425_v36, %v2746_v35 }
 0x29d   : > { %3775 = vmatprep.subr.bf16.mxu0 %v2939_v42  ;;  %v2955_v55 = vpack.c.bf16 %v2915_v43, %v2914_v38  ;;  %v2898_v56 = vmax.f32 %v2834_v45, 0.0  ;;  %v2899_v57 = vmax.f32 %v2835_v46, 0.0  ;;  %v2848_v58 = vadd.f32 %v4425_v36, %v2777_v41 }
 0x29e   : > { %v2931_v61 = vpack.c.bf16 %v2867_v49, %v2866_v48  ;;  %v2880_v62 = vmax.f32 %v2816_v50, 0.0  ;;  %v2881_v63 = vmax.f32 %v2817_v52, 0.0  ;;  %v2849_v0 = vadd.f32 %v4425_v36, %v2778_v47 }
 0x29f   : > { %3797 = vmatprep.subr.bf16.mxu1 %v2955_v55  ;;  %v2947_v2 = vpack.c.bf16 %v2899_v57, %v2898_v56  ;;  %v2912_v3 = vmax.f32 %v2848_v58, 0.0  ;;  %v2800_v4 = vadd.f32 %v4425_v36, %v2729_v53  ;;  %v2801_v5 = vadd.f32 %v4425_v36, %v2730_v54 }
 0x2a0   : > { %3776 = vmatpush3.bf16.msra.mxu0 %v2931_v61  ;;  %v2938_v6 = vpack.c.bf16 %v2881_v63, %v2880_v62  ;;  %v2913_v7 = vmax.f32 %v2849_v0, 0.0  ;;  %v2832_v8 = vadd.f32 %v4425_v36, %v2761_v59  ;;  %v2833_v9 = vadd.f32 %v4425_v36, %v2762_v60 }
 0x2a1   : > { %3798 = vmatpush3.bf16.msra.mxu1 %v2947_v2  ;;  %v2864_v10 = vmax.f32 %v2800_v4, 0.0  ;;  %v2865_v11 = vmax.f32 %v2801_v5, 0.0  ;;  %v2970_v12 = vcombine.high %v3496_v1, %v3496_v1  ;;  %v2973_v13 = vunpack.c.0.s8 %v4429_v44 }
 0x2a2   : > { %3777 = vmatprep.subr.bf16.mxu0 %v2938_v6  ;;  %v2954_v14 = vpack.c.bf16 %v2913_v7, %v2912_v3  ;;  %v2896_v15 = vmax.f32 %v2832_v8, 0.0  ;;  %v2897_v16 = vmax.f32 %v2833_v9, 0.0 }
 0x2a3   : > { %v2930_v17 = vpack.c.bf16 %v2865_v11, %v2864_v10  ;;  %v2976_v18 = vsub.s32 %v2973_v13, %v4434_v51  ;;  %v2928_v51 = vld [vmem:[#allocation9] sm:$0x3] }
 0x2a4   : > { %3799 = vmatprep.subr.bf16.mxu1 %v2954_v14  ;;  %v2946_v19 = vpack.c.bf16 %v2897_v16, %v2896_v15 }
 0x2a5   : > { %3778 = vmatpush3.bf16.msra.mxu0 %v2930_v17  ;;  %v2984_v20 = vrot.slane %v2970_v12, %v2976_v18  ;;  %v2977_v21 = vrot.slane %v3496_v1, %v2976_v18 }
 0x2a6   : > { %3800 = vmatpush3.bf16.msra.mxu1 %v2946_v19 }
 0x2a7   : > { %3023 = vmatprep.mubr.bf16.mxu0 %v2984_v20  ;;  %v2986_v36 = vcombine.high %v2984_v20, %v2984_v20  ;;  %v2985_v22 = vcombine.high %v2977_v21, %v2977_v21 }
 0x2a8   : > { %3024 = vmatmul.mubr.bf16.vlgmr.msra.gmra.mxu0 %v2977_v21 }
 0x2a9   : > { %3063 = vmatprep.mubr.bf16.mxu1 %v2986_v36 }
 0x2aa   : > { %3064 = vmatmul.mubr.bf16.vlgmr.msra.gmra.mxu1 %v2985_v22 }
 0x368   : > { %v3779_v44 = vpop.f32.mrf.mxu0 }
 0x36a   : > { %v3801_v23 = vpop.f32.mrf.mxu1  ;;  %v3780_v24 = vpop.f32.mrf.mxu0 }
 0x36b   : > { %v3781_v25 = vadd.f32 %v3780_v24, %v3779_v44 }
 0x36c   : > { %v3802_v26 = vpop.f32.mrf.mxu1  ;;  %v3782_v27 = vpop.f32.mrf.mxu0 }
 0x36d   : > { %v3803_v28 = vadd.f32 %v3802_v26, %v3801_v23 }
 0x36e   : > { %v3804_v29 = vpop.f32.mrf.mxu1  ;;  %v3783_v30 = vpop.f32.mrf.mxu0 }
 0x36f   : > { %v3066_v31 = vadd.f32 %v3803_v28, %v3781_v25 }
 0x370   : > { %v3805_v32 = vpop.f32.mrf.mxu1 }
 0x371   : > { %v3071_v33 = vadd.f32 %v3066_v31, %v2928_v51 }
 0x373   : > { %3072 = vst [vmem:[#allocation9] sm:$0x3] %v3071_v33 }
 0x374 PF: > { %p4502_p10 = scmp.eq.s32.totalorder %s3181_s18, 2  ;;  %s4213_s11 = smov [#allocation9]  }
 0x375   : > { %s3080_s12 = sshll.u32 %s4213_s11, 4  ;;  %s3081_s12 = int_to_ptr.vmem [resolvable:$true] %s3080_s12 }
 0x376   : > { %s4144_s13 = scalar_lea.vmem %s3081_s12, 32  ;;  %p4151_p0 = scmp.lt.s32.totalorder %s3081_s12, %s3081_s12 }
 0x377   : > { %p4145_p11 = scmp.ne.s32.totalorder %s3081_s12, %s4144_s13  ;;  %p4152_p6 = scmp.lt.s32.totalorder %s4144_s13, %s4144_s13 }
 0x379   : > { %p4146_p12 = pnand %p4145_p11, %p4502_p10  ;;  %p4153_p1 = por %p4152_p6, %p4151_p0 }
 0x37b   : > { %p4147_p13 = pneg %p4146_p12 }
 0x37d   : > { %p4154_p7 = pnand %p4153_p1, %p4147_p13 }
 0x37f   : > { %4157 = shalt.err (!%p4154_p7)
}
 0x380   : > { %3816 = dma.vmem_to_hbm [thread:$0]  (%p4502_p10), %s3081_s12, 32, %s4530_s4, [#allocation6]  }
 0x381   : > { %4189 = dma.done.wait (%p4502_p10), [#allocation6], 32  }
 0x382   : > { %4191 = vsyncadd (%p4502_p10), [#allocation6], 4294967264 }
 0x383 PF: > { %s19_s17 = sadd.s32 1, %s4202_s17   ;;  %s4536_s15 = smov %s4198_s16 }
 0x384   : > { %p16_p3 = scmp.ge.s32.totalorder %s19_s17, 5   ;;  %s4537_s16 = smov %s4539_s19 }
 0x386   :  { %18 = sbr.rel (!%p16_p3) target bundleno = 5 (0x5), region = 113 }
 0x38b   :  { %3093 = vsyncpa [#allocation5], 1 }
 0x38c   :  { %3095 = vsyncpa [#allocation5 + $0x1], 1 }
 0x38d   :  { %3096 = vsyncpa [#allocation8], 1 }
 0x38e   :  { %3098 = vsyncpa [#allocation8 + $0x1], 1 }
 0x38f   :  { %3099 = vsyncpa [#allocation6], 1 }
 0x390   :  { %3101 = vsyncpa [#allocation6 + $0x1], 1 }

</bundles_post_ra>
